<compile_context>
chip_gen: v7x
topology: tpu7x:2x2x1
jax: 0.10.0
libtpu: 0.0.40
codegen_flags: <defaults>
</compile_context>

<pallas_src>
import math
from types import SimpleNamespace

import numpy as np
import jax
import jax.numpy as jnp
from jax.experimental import pallas as pl
from jax.experimental.pallas import tpu as pltpu

# ----- model hyperparameters (small, consistent with the module) -----
D_MODEL = 32
NUM_HEADS = 4
HEAD_DIM = D_MODEL // NUM_HEADS
D_FF = 64
NUM_LAYERS = 2
VOCAB = 16
LN_EPS = 1e-5
LANES = 128            # all packed weight rows / MLM output padded to 128 lanes


def _round8(n):
    return ((n + 7) // 8) * 8


def _offsets(seq):
    """Row offsets of every section inside the packed [rows, 128] weight buffer."""
    emb = 0                                   # [VOCAB, 2D] : [emb | emb @ pair_swap]
    cos = emb + VOCAB                         # [seq, D]
    sin = cos + seq                           # [seq, D]
    fin = _round8(sin + seq)                  # [8, 128]   : g_f, be_f, b_mlm, 0...
    mlm = fin + 8                             # [D, 128]   : cols 0:VOCAB valid
    layer0 = mlm + D_MODEL
    # per layer: wqkv[D,128]  wo[D,128]  w1[D,128]  w2[128,128]  vec[8,128]
    layer_stride = 3 * D_MODEL + 128 + 8
    total = layer0 + NUM_LAYERS * layer_stride
    return SimpleNamespace(emb=emb, cos=cos, sin=sin, fin=fin, mlm=mlm,
                           layer0=layer0, layer_stride=layer_stride, total=total)


# ---------------------------------------------------------------------------
# Kernel helpers
# ---------------------------------------------------------------------------
def _layer_norm(x, gamma, beta):
    mu = jnp.mean(x, axis=-1, keepdims=True)
    var = jnp.mean((x - mu) ** 2, axis=-1, keepdims=True)
    return (x - mu) * jax.lax.rsqrt(var + LN_EPS) * gamma + beta


def _erf(x):
    # Abramowitz & Stegun 7.1.26 (|abs err| < 1.5e-7): only exp/mul/add/select,
    # all of which lower cleanly in Mosaic.  erf(0) error is killed by x*... in GELU.
    p = 0.3275911
    a1, a2, a3, a4, a5 = (0.254829592, -0.284496736, 1.421413741,
                          -1.453152027, 1.061405429)
    sgn = jnp.where(x >= 0.0, 1.0, -1.0)
    ax = jnp.abs(x)
    t = 1.0 / (1.0 + p * ax)
    poly = ((((a5 * t + a4) * t + a3) * t + a2) * t + a1) * t
    return sgn * (1.0 - poly * jnp.exp(-ax * ax))


def _gelu_exact(x):
    return 0.5 * x * (1.0 + _erf(x * (1.0 / math.sqrt(2.0))))


# ---------------------------------------------------------------------------
# Fused per-batch kernel
# ---------------------------------------------------------------------------
def fused_forward_kernel(tok_ref, w_ref, o_ref):
    f32 = jnp.float32
    S = tok_ref.shape[0]
    D = D_MODEL
    H = NUM_HEADS
    HS = H * S
    off = _offsets(S)
    scale = 1.0 / math.sqrt(HEAD_DIM)

    # ---- token embedding + RoPE (pair-swap matmul folded into the embedding) ----
    tok = tok_ref[...]                                               # [S, 1] int32
    vio = jax.lax.broadcasted_iota(jnp.int32, (S, VOCAB), 1)
    onehot = jnp.where(tok == vio, 1.0, 0.0).astype(f32)             # [S, V]
    er = jnp.dot(onehot, w_ref[off.emb:off.emb + VOCAB, :],
                 preferred_element_type=f32)                         # [S, 128] = [emb | emb@P]
    cos_d = w_ref[off.cos:off.cos + S, 0:D]                          # [S, D]
    sin_d = w_ref[off.sin:off.sin + S, 0:D]
    x = er[:, 0:D] * cos_d + er[:, D:2 * D] * sin_d                  # [S, D]
    # dropout: eval mode -> identity

    # ---- head block mask [H*S, D]: row h*S+j active only on head-h lanes ----
    rows = jax.lax.broadcasted_iota(jnp.int32, (HS, D), 0)
    cols = jax.lax.broadcasted_iota(jnp.int32, (HS, D), 1)
    hm_blk = jnp.zeros((HS, D), f32)
    for h in range(H):
        in_rows = (rows >= h * S) & (rows < (h + 1) * S)
        in_cols = (cols >= h * HEAD_DIM) & (cols < (h + 1) * HEAD_DIM)
        hm_blk = hm_blk + jnp.where(in_rows & in_cols, 1.0, 0.0)

    for l in range(NUM_LAYERS):
        base = off.layer0 + l * off.layer_stride
        wqkv = w_ref[base:base + D, :]                               # [D, 128] (cols 0:3D)
        wo = w_ref[base + D:base + 2 * D, :]                         # [D, 128] (cols 0:D)
        w1 = w_ref[base + 2 * D:base + 3 * D, :]                     # [D, 128] (cols 0:D_FF)
        w2 = w_ref[base + 3 * D:base + 3 * D + 128, :]               # [128,128] (rows 0:D_FF, cols 0:D)
        vec = w_ref[base + 3 * D + 128:base + 3 * D + 128 + 8, :]    # [8, 128] packed vectors
        b_qkv, b_o = vec[0:1, :], vec[1:2, :]
        g1, be1 = vec[2:3, 0:D], vec[3:4, 0:D]
        b1, b2 = vec[4:5, :], vec[5:6, :]
        g2, be2 = vec[6:7, 0:D], vec[7:8, 0:D]

        # fused QKV projection: one MXU push, N lane-padded to 128
        qkv = jnp.dot(x, wqkv, preferred_element_type=f32) + b_qkv   # [S, 128]
        q = qkv[:, 0:D]
        k = qkv[:, D:2 * D]
        v = qkv[:, 2 * D:3 * D]

        # ---- multi-head attention: ALL heads in 2 MXU pushes ----
        # krep/vrep: head-masked copies of k/v stacked along rows -> [H*S, D]
        krep = jnp.concatenate([k] * H, axis=0) * hm_blk
        vrep = jnp.concatenate([v] * H, axis=0) * hm_blk
        # vaug = [masked v | head indicator]; the PV matmul then yields both the
        # unnormalized per-head context (lanes 0:D) and the per-head softmax
        # denominators (lanes D:2D) in one push.
        vaug = jnp.concatenate([vrep, hm_blk], axis=1)               # [H*S, 2D]

        sc = jax.lax.dot_general(q, krep, (((1,), (1,)), ((), ())),
                                 preferred_element_type=f32) * scale  # [S, H*S]
        sc = sc - jnp.max(sc, axis=-1, keepdims=True)  # per-row shift (softmax-invariant)
        e = jnp.exp(sc)
        pv = jnp.dot(e, vaug, preferred_element_type=f32)            # [S, 2D]
        ctx = pv[:, 0:D] / pv[:, D:2 * D]                            # normalized head-concat context

        attn = jnp.dot(ctx, wo, preferred_element_type=f32) + b_o    # [S, 128]
        y = _layer_norm(x + attn[:, 0:D], g1, be1)                   # residual + LN1

        h1 = jnp.dot(y, w1, preferred_element_type=f32) + b1         # [S, 128] (lanes >= D_FF are 0)
        h1 = _gelu_exact(h1)                                         # exact (erf) GELU
        ffn = jnp.dot(h1, w2, preferred_element_type=f32) + b2       # [S, 128]
        x = _layer_norm(y + ffn[:, 0:D], g2, be2)                    # residual + LN2

    # ---- final LayerNorm + MLM head (output lane-padded to 128) ----
    fin = w_ref[off.fin:off.fin + 8, :]
    g_f, be_f, b_mlm = fin[0:1, 0:D], fin[1:2, 0:D], fin[2:3, :]
    wmlm = w_ref[off.mlm:off.mlm + D, :]
    yf = _layer_norm(x, g_f, be_f)
    o_ref[...] = (jnp.dot(yf, wmlm, preferred_element_type=f32) + b_mlm).astype(o_ref.dtype)


# ---------------------------------------------------------------------------
# Wrapper
# ---------------------------------------------------------------------------
@jax.jit
def protein_transformer_forward(tokens, wbuf):
    B, S = tokens.shape
    off = _offsets(S)
    assert wbuf.shape == (off.total, LANES), (
        "packed weight buffer was built for a different sequence length")
    tok = tokens.reshape(B * S, 1).astype(jnp.int32)

    out = pl.pallas_call(
        fused_forward_kernel,
        out_shape=jax.ShapeDtypeStruct((B * S, LANES), jnp.float32),
        grid_spec=pltpu.PrefetchScalarGridSpec(
            num_scalar_prefetch=0,
            grid=(B,),
            in_specs=[
                pl.BlockSpec((S, 1), lambda b: (b, 0)),               # this batch's tokens
                pl.BlockSpec((off.total, LANES), lambda b: (0, 0)),   # weights: fetched once, resident
            ],
            out_specs=pl.BlockSpec((S, LANES), lambda b: (b, 0)),
        ),
        compiler_params=pltpu.CompilerParams(
            dimension_semantics=("parallel",)),
    )(tok, wbuf)

    # drop lane padding, restore [B, S, V]
    return out[:, :VOCAB].reshape(B, S, VOCAB)


# ---------------------------------------------------------------------------
# Parameter init / packing (single [rows, 128] f32 buffer)
# ---------------------------------------------------------------------------
def init_params(key, seq):
    off = _offsets(seq)
    keys = iter(jax.random.split(key, 27))

    def xavier(shape):
        lim = math.sqrt(6.0 / (shape[0] + shape[1]))
        return np.asarray(jax.random.uniform(next(keys), shape, jnp.float32, -lim, lim))

    def bias(fan_in, size):
        b = 1.0 / math.sqrt(fan_in)
        return np.asarray(jax.random.uniform(next(keys), (size,), jnp.float32, -b, b))

    wbuf = np.zeros((off.total, LANES), np.float32)

    # token embedding, with the RoPE pair-swap matmul folded in: [emb | emb @ P]
    P = np.zeros((D_MODEL, D_MODEL), np.float32)
    P[np.arange(1, D_MODEL, 2), np.arange(0, D_MODEL, 2)] = -1.0
    P[np.arange(0, D_MODEL, 2), np.arange(1, D_MODEL, 2)] = 1.0
    emb = xavier((VOCAB, D_MODEL))
    wbuf[off.emb:off.emb + VOCAB, 0:D_MODEL] = emb
    wbuf[off.emb:off.emb + VOCAB, D_MODEL:2 * D_MODEL] = emb @ P

    # RoPE cos/sin tables (per position, duplicated per even/odd pair)
    inv_freq = 1.0 / (10000.0 ** (np.arange(0, D_MODEL, 2, dtype=np.float32) / D_MODEL))
    ang = np.arange(seq, dtype=np.float32)[:, None] * inv_freq[None, :]
    wbuf[off.cos:off.cos + seq, 0:D_MODEL] = np.repeat(np.cos(ang), 2, axis=1)
    wbuf[off.sin:off.sin + seq, 0:D_MODEL] = np.repeat(np.sin(ang), 2, axis=1)

    # final LayerNorm (gamma=1, beta=0) + MLM head (weight/bias, lane-padded)
    wbuf[off.fin + 0, 0:D_MODEL] = 1.0                                # g_f
    wbuf[off.mlm:off.mlm + D_MODEL, 0:VOCAB] = xavier((D_MODEL, VOCAB))
    wbuf[off.fin + 2, 0:VOCAB] = bias(D_MODEL, VOCAB)                 # b_mlm

    for l in range(NUM_LAYERS):
        base = off.layer0 + l * off.layer_stride
        wq, wk, wv = (xavier((D_MODEL, D_MODEL)), xavier((D_MODEL, D_MODEL)),
                      xavier((D_MODEL, D_MODEL)))
        wbuf[base:base + D_MODEL, 0:3 * D_MODEL] = np.concatenate([wq, wk, wv], axis=1)
        wbuf[base + D_MODEL:base + 2 * D_MODEL, 0:D_MODEL] = xavier((D_MODEL, D_MODEL))        # wo
        wbuf[base + 2 * D_MODEL:base + 3 * D_MODEL, 0:D_FF] = xavier((D_MODEL, D_FF))          # w1
        wbuf[base + 3 * D_MODEL:base + 3 * D_MODEL + D_FF, 0:D_MODEL] = xavier((D_FF, D_MODEL))  # w2
        vb = base + 3 * D_MODEL + 128
        wbuf[vb + 0, 0:3 * D_MODEL] = np.concatenate(
            [bias(D_MODEL, D_MODEL), bias(D_MODEL, D_MODEL), bias(D_MODEL, D_MODEL)])          # b_q|b_k|b_v
        wbuf[vb + 1, 0:D_MODEL] = bias(D_MODEL, D_MODEL)              # b_o
        wbuf[vb + 2, 0:D_MODEL] = 1.0                                 # LN1 gamma (beta row stays 0)
        wbuf[vb + 4, 0:D_FF] = bias(D_MODEL, D_FF)                    # b1
        wbuf[vb + 5, 0:D_MODEL] = bias(D_FF, D_MODEL)                 # b2
        wbuf[vb + 6, 0:D_MODEL] = 1.0                                 # LN2 gamma (beta row stays 0)

    return jnp.asarray(wbuf)


# ---------------------------------------------------------------------------
# Pure-JAX reference (same packed params) for a self-check
# ---------------------------------------------------------------------------
def _ref_layer_norm(x, g, b):
    mu = jnp.mean(x, axis=-1, keepdims=True)
    var = jnp.mean((x - mu) ** 2, axis=-1, keepdims=True)
    return (x - mu) / jnp.sqrt(var + LN_EPS) * g + b


def reference_forward(tokens, wbuf):
    B, S = tokens.shape
    D = D_MODEL
    off = _offsets(S)

    emb = wbuf[off.emb:off.emb + VOCAB, 0:D]
    cos = wbuf[off.cos:off.cos + S, 0:D]
    sin = wbuf[off.sin:off.sin + S, 0:D]

    x = emb[tokens]                                                   # [B, S, D]
    x1, x2 = x[..., 0::2], x[..., 1::2]
    c, s = cos[:, 0::2], sin[:, 0::2]
    x = jnp.stack([x1 * c - x2 * s, x1 * s + x2 * c], axis=-1).reshape(B, S, D)

    for l in range(NUM_LAYERS):
        base = off.layer0 + l * off.layer_stride
        wqkv = wbuf[base:base + D, 0:3 * D]
        wo = wbuf[base + D:base + 2 * D, 0:D]
        w1 = wbuf[base + 2 * D:base + 3 * D, 0:D_FF]
        w2 = wbuf[base + 3 * D:base + 3 * D + D_FF, 0:D]
        vec = wbuf[base + 3 * D + 128:base + 3 * D + 136]
        b_qkv, b_o = vec[0, 0:3 * D], vec[1, 0:D]
        g1, be1 = vec[2, 0:D], vec[3, 0:D]
        b1, b2 = vec[4, 0:D_FF], vec[5, 0:D]
        g2, be2 = vec[6, 0:D], vec[7, 0:D]

        qkv = x @ wqkv + b_qkv
        q, k, v = qkv[..., 0:D], qkv[..., D:2 * D], qkv[..., 2 * D:3 * D]

        def split(t):
            return t.reshape(B, S, NUM_HEADS, HEAD_DIM).transpose(0, 2, 1, 3)

        qh, kh, vh = split(q), split(k), split(v)
        sc = jnp.einsum("bhid,bhjd->bhij", qh, kh) / math.sqrt(HEAD_DIM)
        p = jax.nn.softmax(sc, axis=-1)
        ctx = jnp.einsum("bhij,bhjd->bhid", p, vh).transpose(0, 2, 1, 3).reshape(B, S, D)
        y = _ref_layer_norm(x + (ctx @ wo + b_o), g1, be1)
        ffn = jax.nn.gelu(y @ w1 + b1, approximate=False) @ w2 + b2
        x = _ref_layer_norm(y + ffn, g2, be2)

    fin = wbuf[off.fin:off.fin + 8]
    g_f, be_f, b_mlm = fin[0, 0:D], fin[1, 0:D], fin[2, 0:VOCAB]
    wmlm = wbuf[off.mlm:off.mlm + D, 0:VOCAB]
    return _ref_layer_norm(x, g_f, be_f) @ wmlm + b_mlm


# ---------------------------------------------------------------------------
if __name__ == "__main__":
    key = jax.random.PRNGKey(0)
    k_tok, k_par = jax.random.split(key)

    B, S = 2, 8
    tokens = jax.random.randint(k_tok, (B, S), 0, VOCAB, dtype=jnp.int32)
    wbuf = init_params(k_par, S)

    logits = protein_transformer_forward(tokens, wbuf)
    logits = jax.block_until_ready(logits)

    assert logits.shape == (B, S, VOCAB), logits.shape
    assert logits.dtype == jnp.float32
    assert bool(jnp.all(jnp.isfinite(logits)))

    # self-check against a plain-JAX reference using the identical packed params
    with jax.default_matmul_precision("highest"):
        ref = reference_forward(tokens, wbuf)
    ref = jax.block_until_ready(ref)
    np.testing.assert_allclose(np.asarray(logits), np.asarray(ref), rtol=2e-2, atol=2e-2)

    print("KERNEL_OK")
</pallas_src>

<mosaic_0001>
module attributes {stable_mosaic.version = 11 : i64} {
  func.func @fused_forward_kernel(%arg0: i32, %arg1: memref<8x1xi32, #tpu.memory_space<vmem>>, %arg2: memref<536x128xf32, #tpu.memory_space<vmem>>, %arg3: memref<8x128xf32, #tpu.memory_space<vmem>>) attributes {dimension_semantics = [#tpu.dimension_semantics<parallel>], iteration_bounds = array<i64: 2>, scalar_prefetch = 0 : i64, scratch_operands = 0 : i64, tpu.core_type = #tpu.core_type<tc>, window_params = [{transform_indices = @transform_0, window_bounds = array<i64: 8, 1>}, {pipeline_mode = #tpu.pipeline_mode<synchronous>, transform_indices = @transform_1, window_bounds = array<i64: 536, 128>}, {transform_indices = @transform_2, window_bounds = array<i64: 8, 128>}]} {
    %c0 = arith.constant 0 : index
    %c0_0 = arith.constant 0 : index
    %0 = vector.load %arg1[%c0, %c0_0] : memref<8x1xi32, #tpu.memory_space<vmem>>, vector<8x1xi32>
    %1 = tpu.iota {dimensions = array<i32: 1>} : vector<8x16xi32>
    %2 = vector.broadcast %0 : vector<8x1xi32> to vector<8x16xi32>
    %3 = arith.cmpi eq, %2, %1 : vector<8x16xi32>
    %cst = arith.constant 1.000000e+00 : f32
    %cst_1 = arith.constant 0.000000e+00 : f32
    %4 = vector.broadcast %cst : f32 to vector<8x16xf32>
    %5 = vector.broadcast %cst_1 : f32 to vector<8x16xf32>
    %6 = arith.select %3, %4, %5 : vector<8x16xi1>, vector<8x16xf32>
    %c0_2 = arith.constant 0 : index
    %c0_3 = arith.constant 0 : index
    %7 = vector.load %arg2[%c0_2, %c0_3] : memref<536x128xf32, #tpu.memory_space<vmem>>, vector<16x128xf32>
    %cst_4 = arith.constant dense<0.000000e+00> : vector<8x128xf32>
    %8 = tpu.matmul %6, %7, %cst_4 {dimension_numbers = #tpu.dot_dimension_numbers<[1], [0], [0], [1], [0, 0, 1, 1], [], []>} : vector<8x16xf32>, vector<16x128xf32>, vector<8x128xf32> -> vector<8x128xf32>
    %c16 = arith.constant 16 : index
    %c0_5 = arith.constant 0 : index
    %9 = vector.load %arg2[%c16, %c0_5] : memref<536x128xf32, #tpu.memory_space<vmem>>, vector<8x32xf32>
    %c24 = arith.constant 24 : index
    %c0_6 = arith.constant 0 : index
    %10 = vector.load %arg2[%c24, %c0_6] : memref<536x128xf32, #tpu.memory_space<vmem>>, vector<8x32xf32>
    %11 = vector.extract_strided_slice %8 {offsets = [0, 0], sizes = [8, 32], strides = [1, 1]} : vector<8x128xf32> to vector<8x32xf32>
    %12 = arith.mulf %11, %9 : vector<8x32xf32>
    %13 = vector.extract_strided_slice %8 {offsets = [0, 32], sizes = [8, 32], strides = [1, 1]} : vector<8x128xf32> to vector<8x32xf32>
    %14 = arith.mulf %13, %10 : vector<8x32xf32>
    %15 = arith.addf %12, %14 : vector<8x32xf32>
    %16 = tpu.iota {dimensions = array<i32: 0>} : vector<32x32xi32>
    %17 = tpu.iota {dimensions = array<i32: 1>} : vector<32x32xi32>
    %cst_7 = arith.constant 0.000000e+00 : f32
    %18 = vector.broadcast %cst_7 : f32 to vector<32x32xf32>
    %c0_i32 = arith.constant 0 : i32
    %19 = vector.broadcast %c0_i32 : i32 to vector<32x32xi32>
    %20 = arith.cmpi sge, %16, %19 : vector<32x32xi32>
    %c8_i32 = arith.constant 8 : i32
    %21 = vector.broadcast %c8_i32 : i32 to vector<32x32xi32>
    %22 = arith.cmpi slt, %16, %21 : vector<32x32xi32>
    %23 = arith.andi %20, %22 : vector<32x32xi1>
    %c0_i32_8 = arith.constant 0 : i32
    %24 = vector.broadcast %c0_i32_8 : i32 to vector<32x32xi32>
    %25 = arith.cmpi sge, %17, %24 : vector<32x32xi32>
    %c8_i32_9 = arith.constant 8 : i32
    %26 = vector.broadcast %c8_i32_9 : i32 to vector<32x32xi32>
    %27 = arith.cmpi slt, %17, %26 : vector<32x32xi32>
    %28 = arith.andi %25, %27 : vector<32x32xi1>
    %29 = arith.andi %23, %28 : vector<32x32xi1>
    %cst_10 = arith.constant 1.000000e+00 : f32
    %cst_11 = arith.constant 0.000000e+00 : f32
    %30 = vector.broadcast %cst_10 : f32 to vector<32x32xf32>
    %31 = vector.broadcast %cst_11 : f32 to vector<32x32xf32>
    %32 = arith.select %29, %30, %31 : vector<32x32xi1>, vector<32x32xf32>
    %33 = arith.addf %18, %32 : vector<32x32xf32>
    %c8_i32_12 = arith.constant 8 : i32
    %34 = vector.broadcast %c8_i32_12 : i32 to vector<32x32xi32>
    %35 = arith.cmpi sge, %16, %34 : vector<32x32xi32>
    %c16_i32 = arith.constant 16 : i32
    %36 = vector.broadcast %c16_i32 : i32 to vector<32x32xi32>
    %37 = arith.cmpi slt, %16, %36 : vector<32x32xi32>
    %38 = arith.andi %35, %37 : vector<32x32xi1>
    %c8_i32_13 = arith.constant 8 : i32
    %39 = vector.broadcast %c8_i32_13 : i32 to vector<32x32xi32>
    %40 = arith.cmpi sge, %17, %39 : vector<32x32xi32>
    %c16_i32_14 = arith.constant 16 : i32
    %41 = vector.broadcast %c16_i32_14 : i32 to vector<32x32xi32>
    %42 = arith.cmpi slt, %17, %41 : vector<32x32xi32>
    %43 = arith.andi %40, %42 : vector<32x32xi1>
    %44 = arith.andi %38, %43 : vector<32x32xi1>
    %cst_15 = arith.constant 1.000000e+00 : f32
    %cst_16 = arith.constant 0.000000e+00 : f32
    %45 = vector.broadcast %cst_15 : f32 to vector<32x32xf32>
    %46 = vector.broadcast %cst_16 : f32 to vector<32x32xf32>
    %47 = arith.select %44, %45, %46 : vector<32x32xi1>, vector<32x32xf32>
    %48 = arith.addf %33, %47 : vector<32x32xf32>
    %c16_i32_17 = arith.constant 16 : i32
    %49 = vector.broadcast %c16_i32_17 : i32 to vector<32x32xi32>
    %50 = arith.cmpi sge, %16, %49 : vector<32x32xi32>
    %c24_i32 = arith.constant 24 : i32
    %51 = vector.broadcast %c24_i32 : i32 to vector<32x32xi32>
    %52 = arith.cmpi slt, %16, %51 : vector<32x32xi32>
    %53 = arith.andi %50, %52 : vector<32x32xi1>
    %c16_i32_18 = arith.constant 16 : i32
    %54 = vector.broadcast %c16_i32_18 : i32 to vector<32x32xi32>
    %55 = arith.cmpi sge, %17, %54 : vector<32x32xi32>
    %c24_i32_19 = arith.constant 24 : i32
    %56 = vector.broadcast %c24_i32_19 : i32 to vector<32x32xi32>
    %57 = arith.cmpi slt, %17, %56 : vector<32x32xi32>
    %58 = arith.andi %55, %57 : vector<32x32xi1>
    %59 = arith.andi %53, %58 : vector<32x32xi1>
    %cst_20 = arith.constant 1.000000e+00 : f32
    %cst_21 = arith.constant 0.000000e+00 : f32
    %60 = vector.broadcast %cst_20 : f32 to vector<32x32xf32>
    %61 = vector.broadcast %cst_21 : f32 to vector<32x32xf32>
    %62 = arith.select %59, %60, %61 : vector<32x32xi1>, vector<32x32xf32>
    %63 = arith.addf %48, %62 : vector<32x32xf32>
    %c24_i32_22 = arith.constant 24 : i32
    %64 = vector.broadcast %c24_i32_22 : i32 to vector<32x32xi32>
    %65 = arith.cmpi sge, %16, %64 : vector<32x32xi32>
    %c32_i32 = arith.constant 32 : i32
    %66 = vector.broadcast %c32_i32 : i32 to vector<32x32xi32>
    %67 = arith.cmpi slt, %16, %66 : vector<32x32xi32>
    %68 = arith.andi %65, %67 : vector<32x32xi1>
    %c24_i32_23 = arith.constant 24 : i32
    %69 = vector.broadcast %c24_i32_23 : i32 to vector<32x32xi32>
    %70 = arith.cmpi sge, %17, %69 : vector<32x32xi32>
    %c32_i32_24 = arith.constant 32 : i32
    %71 = vector.broadcast %c32_i32_24 : i32 to vector<32x32xi32>
    %72 = arith.cmpi slt, %17, %71 : vector<32x32xi32>
    %73 = arith.andi %70, %72 : vector<32x32xi1>
    %74 = arith.andi %68, %73 : vector<32x32xi1>
    %cst_25 = arith.constant 1.000000e+00 : f32
    %cst_26 = arith.constant 0.000000e+00 : f32
    %75 = vector.broadcast %cst_25 : f32 to vector<32x32xf32>
    %76 = vector.broadcast %cst_26 : f32 to vector<32x32xf32>
    %77 = arith.select %74, %75, %76 : vector<32x32xi1>, vector<32x32xf32>
    %78 = arith.addf %63, %77 : vector<32x32xf32>
    %c72 = arith.constant 72 : index
    %c0_27 = arith.constant 0 : index
    %79 = vector.load %arg2[%c72, %c0_27] : memref<536x128xf32, #tpu.memory_space<vmem>>, vector<32x128xf32>
    %c104 = arith.constant 104 : index
    %c0_28 = arith.constant 0 : index
    %80 = vector.load %arg2[%c104, %c0_28] : memref<536x128xf32, #tpu.memory_space<vmem>>, vector<32x128xf32>
    %c136 = arith.constant 136 : index
    %c0_29 = arith.constant 0 : index
    %81 = vector.load %arg2[%c136, %c0_29] : memref<536x128xf32, #tpu.memory_space<vmem>>, vector<32x128xf32>
    %c168 = arith.constant 168 : index
    %c0_30 = arith.constant 0 : index
    %82 = vector.load %arg2[%c168, %c0_30] : memref<536x128xf32, #tpu.memory_space<vmem>>, vector<128x128xf32>
    %c296 = arith.constant 296 : index
    %c0_31 = arith.constant 0 : index
    %83 = vector.load %arg2[%c296, %c0_31] : memref<536x128xf32, #tpu.memory_space<vmem>>, vector<8x128xf32>
    %84 = vector.extract_strided_slice %83 {offsets = [0, 0], sizes = [1, 128], strides = [1, 1]} : vector<8x128xf32> to vector<1x128xf32>
    %85 = vector.extract_strided_slice %83 {offsets = [1, 0], sizes = [1, 128], strides = [1, 1]} : vector<8x128xf32> to vector<1x128xf32>
    %86 = vector.extract_strided_slice %83 {offsets = [2, 0], sizes = [1, 32], strides = [1, 1]} : vector<8x128xf32> to vector<1x32xf32>
    %87 = vector.extract_strided_slice %83 {offsets = [3, 0], sizes = [1, 32], strides = [1, 1]} : vector<8x128xf32> to vector<1x32xf32>
    %88 = vector.extract_strided_slice %83 {offsets = [4, 0], sizes = [1, 128], strides = [1, 1]} : vector<8x128xf32> to vector<1x128xf32>
    %89 = vector.extract_strided_slice %83 {offsets = [5, 0], sizes = [1, 128], strides = [1, 1]} : vector<8x128xf32> to vector<1x128xf32>
    %90 = vector.extract_strided_slice %83 {offsets = [6, 0], sizes = [1, 32], strides = [1, 1]} : vector<8x128xf32> to vector<1x32xf32>
    %91 = vector.extract_strided_slice %83 {offsets = [7, 0], sizes = [1, 32], strides = [1, 1]} : vector<8x128xf32> to vector<1x32xf32>
    %cst_32 = arith.constant dense<0.000000e+00> : vector<8x128xf32>
    %92 = tpu.matmul %15, %79, %cst_32 {dimension_numbers = #tpu.dot_dimension_numbers<[1], [0], [0], [1], [0, 0, 1, 1], [], []>} : vector<8x32xf32>, vector<32x128xf32>, vector<8x128xf32> -> vector<8x128xf32>
    %93 = vector.broadcast %84 : vector<1x128xf32> to vector<8x128xf32>
    %94 = arith.addf %92, %93 : vector<8x128xf32>
    %95 = vector.extract_strided_slice %94 {offsets = [0, 0], sizes = [8, 32], strides = [1, 1]} : vector<8x128xf32> to vector<8x32xf32>
    %96 = vector.extract_strided_slice %94 {offsets = [0, 32], sizes = [8, 32], strides = [1, 1]} : vector<8x128xf32> to vector<8x32xf32>
    %97 = vector.extract_strided_slice %94 {offsets = [0, 64], sizes = [8, 32], strides = [1, 1]} : vector<8x128xf32> to vector<8x32xf32>
    %98 = tpu.concatenate %96, %96, %96, %96 in 0 : vector<8x32xf32>, vector<8x32xf32>, vector<8x32xf32>, vector<8x32xf32> -> vector<32x32xf32>
    %99 = arith.mulf %98, %78 : vector<32x32xf32>
    %100 = tpu.concatenate %97, %97, %97, %97 in 0 : vector<8x32xf32>, vector<8x32xf32>, vector<8x32xf32>, vector<8x32xf32> -> vector<32x32xf32>
    %101 = arith.mulf %100, %78 : vector<32x32xf32>
    %102 = tpu.concatenate %101, %78 in 1 : vector<32x32xf32>, vector<32x32xf32> -> vector<32x64xf32>
    %cst_33 = arith.constant dense<0.000000e+00> : vector<8x32xf32>
    %103 = tpu.matmul %95, %99, %cst_33 {dimension_numbers = #tpu.dot_dimension_numbers<[1], [1], [0], [0], [0, 0, 1, 0], [], []>} : vector<8x32xf32>, vector<32x32xf32>, vector<8x32xf32> -> vector<8x32xf32>
    %cst_34 = arith.constant 0.353553385 : f32
    %104 = vector.broadcast %cst_34 : f32 to vector<8x32xf32>
    %105 = arith.mulf %103, %104 : vector<8x32xf32>
    %cst_35 = arith.constant dense<0xFF800000> : vector<8xf32>
    %106 = vector.multi_reduction <maximumf>, %105, %cst_35 [1] : vector<8x32xf32> to vector<8xf32>
    %107 = vector.shape_cast %106 : vector<8xf32> to vector<8x1xf32>
    %108 = vector.broadcast %107 : vector<8x1xf32> to vector<8x32xf32>
    %109 = arith.subf %105, %108 : vector<8x32xf32>
    %110 = math.exp %109 : vector<8x32xf32>
    %cst_36 = arith.constant dense<0.000000e+00> : vector<8x64xf32>
    %111 = tpu.matmul %110, %102, %cst_36 {dimension_numbers = #tpu.dot_dimension_numbers<[1], [0], [0], [1], [0, 0, 1, 1], [], []>} : vector<8x32xf32>, vector<32x64xf32>, vector<8x64xf32> -> vector<8x64xf32>
    %112 = vector.extract_strided_slice %111 {offsets = [0, 0], sizes = [8, 32], strides = [1, 1]} : vector<8x64xf32> to vector<8x32xf32>
    %113 = vector.extract_strided_slice %111 {offsets = [0, 32], sizes = [8, 32], strides = [1, 1]} : vector<8x64xf32> to vector<8x32xf32>
    %114 = arith.divf %112, %113 : vector<8x32xf32>
    %cst_37 = arith.constant dense<0.000000e+00> : vector<8x128xf32>
    %115 = tpu.matmul %114, %80, %cst_37 {dimension_numbers = #tpu.dot_dimension_numbers<[1], [0], [0], [1], [0, 0, 1, 1], [], []>} : vector<8x32xf32>, vector<32x128xf32>, vector<8x128xf32> -> vector<8x128xf32>
    %116 = vector.broadcast %85 : vector<1x128xf32> to vector<8x128xf32>
    %117 = arith.addf %115, %116 : vector<8x128xf32>
    %118 = vector.extract_strided_slice %117 {offsets = [0, 0], sizes = [8, 32], strides = [1, 1]} : vector<8x128xf32> to vector<8x32xf32>
    %119 = arith.addf %15, %118 : vector<8x32xf32>
    %cst_38 = arith.constant dense<0.000000e+00> : vector<8xf32>
    %120 = vector.multi_reduction <add>, %119, %cst_38 [1] : vector<8x32xf32> to vector<8xf32>
    %121 = vector.shape_cast %120 : vector<8xf32> to vector<8x1xf32>
    %cst_39 = arith.constant 3.200000e+01 : f32
    %122 = vector.broadcast %cst_39 : f32 to vector<8x1xf32>
    %123 = arith.divf %121, %122 : vector<8x1xf32>
    %124 = vector.broadcast %123 : vector<8x1xf32> to vector<8x32xf32>
    %125 = arith.subf %119, %124 : vector<8x32xf32>
    %126 = arith.mulf %125, %125 : vector<8x32xf32>
    %cst_40 = arith.constant dense<0.000000e+00> : vector<8xf32>
    %127 = vector.multi_reduction <add>, %126, %cst_40 [1] : vector<8x32xf32> to vector<8xf32>
    %128 = vector.shape_cast %127 : vector<8xf32> to vector<8x1xf32>
    %cst_41 = arith.constant 3.200000e+01 : f32
    %129 = vector.broadcast %cst_41 : f32 to vector<8x1xf32>
    %130 = arith.divf %128, %129 : vector<8x1xf32>
    %131 = vector.broadcast %123 : vector<8x1xf32> to vector<8x32xf32>
    %132 = arith.subf %119, %131 : vector<8x32xf32>
    %cst_42 = arith.constant 9.99999974E-6 : f32
    %133 = vector.broadcast %cst_42 : f32 to vector<8x1xf32>
    %134 = arith.addf %130, %133 : vector<8x1xf32>
    %135 = math.rsqrt %134 : vector<8x1xf32>
    %136 = vector.broadcast %135 : vector<8x1xf32> to vector<8x32xf32>
    %137 = arith.mulf %132, %136 : vector<8x32xf32>
    %138 = vector.broadcast %86 : vector<1x32xf32> to vector<8x32xf32>
    %139 = arith.mulf %137, %138 : vector<8x32xf32>
    %140 = vector.broadcast %87 : vector<1x32xf32> to vector<8x32xf32>
    %141 = arith.addf %139, %140 : vector<8x32xf32>
    %cst_43 = arith.constant dense<0.000000e+00> : vector<8x128xf32>
    %142 = tpu.matmul %141, %81, %cst_43 {dimension_numbers = #tpu.dot_dimension_numbers<[1], [0], [0], [1], [0, 0, 1, 1], [], []>} : vector<8x32xf32>, vector<32x128xf32>, vector<8x128xf32> -> vector<8x128xf32>
    %143 = vector.broadcast %88 : vector<1x128xf32> to vector<8x128xf32>
    %144 = arith.addf %142, %143 : vector<8x128xf32>
    %cst_44 = arith.constant 5.000000e-01 : f32
    %145 = vector.broadcast %cst_44 : f32 to vector<8x128xf32>
    %146 = arith.mulf %145, %144 : vector<8x128xf32>
    %cst_45 = arith.constant 0.707106769 : f32
    %147 = vector.broadcast %cst_45 : f32 to vector<8x128xf32>
    %148 = arith.mulf %144, %147 : vector<8x128xf32>
    %cst_46 = arith.constant 0.000000e+00 : f32
    %149 = vector.broadcast %cst_46 : f32 to vector<8x128xf32>
    %150 = arith.cmpf oge, %148, %149 : vector<8x128xf32>
    %cst_47 = arith.constant 1.000000e+00 : f32
    %cst_48 = arith.constant -1.000000e+00 : f32
    %151 = vector.broadcast %cst_47 : f32 to vector<8x128xf32>
    %152 = vector.broadcast %cst_48 : f32 to vector<8x128xf32>
    %153 = arith.select %150, %151, %152 : vector<8x128xi1>, vector<8x128xf32>
    %154 = math.absf %148 : vector<8x128xf32>
    %cst_49 = arith.constant 0.327591091 : f32
    %155 = vector.broadcast %cst_49 : f32 to vector<8x128xf32>
    %156 = arith.mulf %155, %154 : vector<8x128xf32>
    %cst_50 = arith.constant 1.000000e+00 : f32
    %157 = vector.broadcast %cst_50 : f32 to vector<8x128xf32>
    %158 = arith.addf %157, %156 : vector<8x128xf32>
    %cst_51 = arith.constant 1.000000e+00 : f32
    %159 = vector.broadcast %cst_51 : f32 to vector<8x128xf32>
    %160 = arith.divf %159, %158 : vector<8x128xf32>
    %cst_52 = arith.constant 1.06140542 : f32
    %161 = vector.broadcast %cst_52 : f32 to vector<8x128xf32>
    %162 = arith.mulf %161, %160 : vector<8x128xf32>
    %cst_53 = arith.constant -1.45315206 : f32
    %163 = vector.broadcast %cst_53 : f32 to vector<8x128xf32>
    %164 = arith.addf %162, %163 : vector<8x128xf32>
    %165 = arith.mulf %164, %160 : vector<8x128xf32>
    %cst_54 = arith.constant 1.42141378 : f32
    %166 = vector.broadcast %cst_54 : f32 to vector<8x128xf32>
    %167 = arith.addf %165, %166 : vector<8x128xf32>
    %168 = arith.mulf %167, %160 : vector<8x128xf32>
    %cst_55 = arith.constant -0.284496725 : f32
    %169 = vector.broadcast %cst_55 : f32 to vector<8x128xf32>
    %170 = arith.addf %168, %169 : vector<8x128xf32>
    %171 = arith.mulf %170, %160 : vector<8x128xf32>
    %cst_56 = arith.constant 0.254829586 : f32
    %172 = vector.broadcast %cst_56 : f32 to vector<8x128xf32>
    %173 = arith.addf %171, %172 : vector<8x128xf32>
    %174 = arith.mulf %173, %160 : vector<8x128xf32>
    %cst_57 = arith.constant 0.000000e+00 : f32
    %175 = vector.broadcast %cst_57 : f32 to vector<8x128xf32>
    %176 = arith.subf %175, %154 : vector<8x128xf32>
    %177 = arith.mulf %176, %154 : vector<8x128xf32>
    %178 = math.exp %177 : vector<8x128xf32>
    %179 = arith.mulf %174, %178 : vector<8x128xf32>
    %cst_58 = arith.constant 1.000000e+00 : f32
    %180 = vector.broadcast %cst_58 : f32 to vector<8x128xf32>
    %181 = arith.subf %180, %179 : vector<8x128xf32>
    %182 = arith.mulf %153, %181 : vector<8x128xf32>
    %cst_59 = arith.constant 1.000000e+00 : f32
    %183 = vector.broadcast %cst_59 : f32 to vector<8x128xf32>
    %184 = arith.addf %183, %182 : vector<8x128xf32>
    %185 = arith.mulf %146, %184 : vector<8x128xf32>
    %cst_60 = arith.constant dense<0.000000e+00> : vector<8x128xf32>
    %186 = tpu.matmul %185, %82, %cst_60 {dimension_numbers = #tpu.dot_dimension_numbers<[1], [0], [0], [1], [0, 0, 1, 1], [], []>} : vector<8x128xf32>, vector<128x128xf32>, vector<8x128xf32> -> vector<8x128xf32>
    %187 = vector.broadcast %89 : vector<1x128xf32> to vector<8x128xf32>
    %188 = arith.addf %186, %187 : vector<8x128xf32>
    %189 = vector.extract_strided_slice %188 {offsets = [0, 0], sizes = [8, 32], strides = [1, 1]} : vector<8x128xf32> to vector<8x32xf32>
    %190 = arith.addf %141, %189 : vector<8x32xf32>
    %cst_61 = arith.constant dense<0.000000e+00> : vector<8xf32>
    %191 = vector.multi_reduction <add>, %190, %cst_61 [1] : vector<8x32xf32> to vector<8xf32>
    %192 = vector.shape_cast %191 : vector<8xf32> to vector<8x1xf32>
    %cst_62 = arith.constant 3.200000e+01 : f32
    %193 = vector.broadcast %cst_62 : f32 to vector<8x1xf32>
    %194 = arith.divf %192, %193 : vector<8x1xf32>
    %195 = vector.broadcast %194 : vector<8x1xf32> to vector<8x32xf32>
    %196 = arith.subf %190, %195 : vector<8x32xf32>
    %197 = arith.mulf %196, %196 : vector<8x32xf32>
    %cst_63 = arith.constant dense<0.000000e+00> : vector<8xf32>
    %198 = vector.multi_reduction <add>, %197, %cst_63 [1] : vector<8x32xf32> to vector<8xf32>
    %199 = vector.shape_cast %198 : vector<8xf32> to vector<8x1xf32>
    %cst_64 = arith.constant 3.200000e+01 : f32
    %200 = vector.broadcast %cst_64 : f32 to vector<8x1xf32>
    %201 = arith.divf %199, %200 : vector<8x1xf32>
    %202 = vector.broadcast %194 : vector<8x1xf32> to vector<8x32xf32>
    %203 = arith.subf %190, %202 : vector<8x32xf32>
    %cst_65 = arith.constant 9.99999974E-6 : f32
    %204 = vector.broadcast %cst_65 : f32 to vector<8x1xf32>
    %205 = arith.addf %201, %204 : vector<8x1xf32>
    %206 = math.rsqrt %205 : vector<8x1xf32>
    %207 = vector.broadcast %206 : vector<8x1xf32> to vector<8x32xf32>
    %208 = arith.mulf %203, %207 : vector<8x32xf32>
    %209 = vector.broadcast %90 : vector<1x32xf32> to vector<8x32xf32>
    %210 = arith.mulf %208, %209 : vector<8x32xf32>
    %211 = vector.broadcast %91 : vector<1x32xf32> to vector<8x32xf32>
    %212 = arith.addf %210, %211 : vector<8x32xf32>
    %c304 = arith.constant 304 : index
    %c0_66 = arith.constant 0 : index
    %213 = vector.load %arg2[%c304, %c0_66] : memref<536x128xf32, #tpu.memory_space<vmem>>, vector<32x128xf32>
    %c336 = arith.constant 336 : index
    %c0_67 = arith.constant 0 : index
    %214 = vector.load %arg2[%c336, %c0_67] : memref<536x128xf32, #tpu.memory_space<vmem>>, vector<32x128xf32>
    %c368 = arith.constant 368 : index
    %c0_68 = arith.constant 0 : index
    %215 = vector.load %arg2[%c368, %c0_68] : memref<536x128xf32, #tpu.memory_space<vmem>>, vector<32x128xf32>
    %c400 = arith.constant 400 : index
    %c0_69 = arith.constant 0 : index
    %216 = vector.load %arg2[%c400, %c0_69] : memref<536x128xf32, #tpu.memory_space<vmem>>, vector<128x128xf32>
    %c528 = arith.constant 528 : index
    %c0_70 = arith.constant 0 : index
    %217 = vector.load %arg2[%c528, %c0_70] : memref<536x128xf32, #tpu.memory_space<vmem>>, vector<8x128xf32>
    %218 = vector.extract_strided_slice %217 {offsets = [0, 0], sizes = [1, 128], strides = [1, 1]} : vector<8x128xf32> to vector<1x128xf32>
    %219 = vector.extract_strided_slice %217 {offsets = [1, 0], sizes = [1, 128], strides = [1, 1]} : vector<8x128xf32> to vector<1x128xf32>
    %220 = vector.extract_strided_slice %217 {offsets = [2, 0], sizes = [1, 32], strides = [1, 1]} : vector<8x128xf32> to vector<1x32xf32>
    %221 = vector.extract_strided_slice %217 {offsets = [3, 0], sizes = [1, 32], strides = [1, 1]} : vector<8x128xf32> to vector<1x32xf32>
    %222 = vector.extract_strided_slice %217 {offsets = [4, 0], sizes = [1, 128], strides = [1, 1]} : vector<8x128xf32> to vector<1x128xf32>
    %223 = vector.extract_strided_slice %217 {offsets = [5, 0], sizes = [1, 128], strides = [1, 1]} : vector<8x128xf32> to vector<1x128xf32>
    %224 = vector.extract_strided_slice %217 {offsets = [6, 0], sizes = [1, 32], strides = [1, 1]} : vector<8x128xf32> to vector<1x32xf32>
    %225 = vector.extract_strided_slice %217 {offsets = [7, 0], sizes = [1, 32], strides = [1, 1]} : vector<8x128xf32> to vector<1x32xf32>
    %cst_71 = arith.constant dense<0.000000e+00> : vector<8x128xf32>
    %226 = tpu.matmul %212, %213, %cst_71 {dimension_numbers = #tpu.dot_dimension_numbers<[1], [0], [0], [1], [0, 0, 1, 1], [], []>} : vector<8x32xf32>, vector<32x128xf32>, vector<8x128xf32> -> vector<8x128xf32>
    %227 = vector.broadcast %218 : vector<1x128xf32> to vector<8x128xf32>
    %228 = arith.addf %226, %227 : vector<8x128xf32>
    %229 = vector.extract_strided_slice %228 {offsets = [0, 0], sizes = [8, 32], strides = [1, 1]} : vector<8x128xf32> to vector<8x32xf32>
    %230 = vector.extract_strided_slice %228 {offsets = [0, 32], sizes = [8, 32], strides = [1, 1]} : vector<8x128xf32> to vector<8x32xf32>
    %231 = vector.extract_strided_slice %228 {offsets = [0, 64], sizes = [8, 32], strides = [1, 1]} : vector<8x128xf32> to vector<8x32xf32>
    %232 = tpu.concatenate %230, %230, %230, %230 in 0 : vector<8x32xf32>, vector<8x32xf32>, vector<8x32xf32>, vector<8x32xf32> -> vector<32x32xf32>
    %233 = arith.mulf %232, %78 : vector<32x32xf32>
    %234 = tpu.concatenate %231, %231, %231, %231 in 0 : vector<8x32xf32>, vector<8x32xf32>, vector<8x32xf32>, vector<8x32xf32> -> vector<32x32xf32>
    %235 = arith.mulf %234, %78 : vector<32x32xf32>
    %236 = tpu.concatenate %235, %78 in 1 : vector<32x32xf32>, vector<32x32xf32> -> vector<32x64xf32>
    %cst_72 = arith.constant dense<0.000000e+00> : vector<8x32xf32>
    %237 = tpu.matmul %229, %233, %cst_72 {dimension_numbers = #tpu.dot_dimension_numbers<[1], [1], [0], [0], [0, 0, 1, 0], [], []>} : vector<8x32xf32>, vector<32x32xf32>, vector<8x32xf32> -> vector<8x32xf32>
    %cst_73 = arith.constant 0.353553385 : f32
    %238 = vector.broadcast %cst_73 : f32 to vector<8x32xf32>
    %239 = arith.mulf %237, %238 : vector<8x32xf32>
    %cst_74 = arith.constant dense<0xFF800000> : vector<8xf32>
    %240 = vector.multi_reduction <maximumf>, %239, %cst_74 [1] : vector<8x32xf32> to vector<8xf32>
    %241 = vector.shape_cast %240 : vector<8xf32> to vector<8x1xf32>
    %242 = vector.broadcast %241 : vector<8x1xf32> to vector<8x32xf32>
    %243 = arith.subf %239, %242 : vector<8x32xf32>
    %244 = math.exp %243 : vector<8x32xf32>
    %cst_75 = arith.constant dense<0.000000e+00> : vector<8x64xf32>
    %245 = tpu.matmul %244, %236, %cst_75 {dimension_numbers = #tpu.dot_dimension_numbers<[1], [0], [0], [1], [0, 0, 1, 1], [], []>} : vector<8x32xf32>, vector<32x64xf32>, vector<8x64xf32> -> vector<8x64xf32>
    %246 = vector.extract_strided_slice %245 {offsets = [0, 0], sizes = [8, 32], strides = [1, 1]} : vector<8x64xf32> to vector<8x32xf32>
    %247 = vector.extract_strided_slice %245 {offsets = [0, 32], sizes = [8, 32], strides = [1, 1]} : vector<8x64xf32> to vector<8x32xf32>
    %248 = arith.divf %246, %247 : vector<8x32xf32>
    %cst_76 = arith.constant dense<0.000000e+00> : vector<8x128xf32>
    %249 = tpu.matmul %248, %214, %cst_76 {dimension_numbers = #tpu.dot_dimension_numbers<[1], [0], [0], [1], [0, 0, 1, 1], [], []>} : vector<8x32xf32>, vector<32x128xf32>, vector<8x128xf32> -> vector<8x128xf32>
    %250 = vector.broadcast %219 : vector<1x128xf32> to vector<8x128xf32>
    %251 = arith.addf %249, %250 : vector<8x128xf32>
    %252 = vector.extract_strided_slice %251 {offsets = [0, 0], sizes = [8, 32], strides = [1, 1]} : vector<8x128xf32> to vector<8x32xf32>
    %253 = arith.addf %212, %252 : vector<8x32xf32>
    %cst_77 = arith.constant dense<0.000000e+00> : vector<8xf32>
    %254 = vector.multi_reduction <add>, %253, %cst_77 [1] : vector<8x32xf32> to vector<8xf32>
    %255 = vector.shape_cast %254 : vector<8xf32> to vector<8x1xf32>
    %cst_78 = arith.constant 3.200000e+01 : f32
    %256 = vector.broadcast %cst_78 : f32 to vector<8x1xf32>
    %257 = arith.divf %255, %256 : vector<8x1xf32>
    %258 = vector.broadcast %257 : vector<8x1xf32> to vector<8x32xf32>
    %259 = arith.subf %253, %258 : vector<8x32xf32>
    %260 = arith.mulf %259, %259 : vector<8x32xf32>
    %cst_79 = arith.constant dense<0.000000e+00> : vector<8xf32>
    %261 = vector.multi_reduction <add>, %260, %cst_79 [1] : vector<8x32xf32> to vector<8xf32>
    %262 = vector.shape_cast %261 : vector<8xf32> to vector<8x1xf32>
    %cst_80 = arith.constant 3.200000e+01 : f32
    %263 = vector.broadcast %cst_80 : f32 to vector<8x1xf32>
    %264 = arith.divf %262, %263 : vector<8x1xf32>
    %265 = vector.broadcast %257 : vector<8x1xf32> to vector<8x32xf32>
    %266 = arith.subf %253, %265 : vector<8x32xf32>
    %cst_81 = arith.constant 9.99999974E-6 : f32
    %267 = vector.broadcast %cst_81 : f32 to vector<8x1xf32>
    %268 = arith.addf %264, %267 : vector<8x1xf32>
    %269 = math.rsqrt %268 : vector<8x1xf32>
    %270 = vector.broadcast %269 : vector<8x1xf32> to vector<8x32xf32>
    %271 = arith.mulf %266, %270 : vector<8x32xf32>
    %272 = vector.broadcast %220 : vector<1x32xf32> to vector<8x32xf32>
    %273 = arith.mulf %271, %272 : vector<8x32xf32>
    %274 = vector.broadcast %221 : vector<1x32xf32> to vector<8x32xf32>
    %275 = arith.addf %273, %274 : vector<8x32xf32>
    %cst_82 = arith.constant dense<0.000000e+00> : vector<8x128xf32>
    %276 = tpu.matmul %275, %215, %cst_82 {dimension_numbers = #tpu.dot_dimension_numbers<[1], [0], [0], [1], [0, 0, 1, 1], [], []>} : vector<8x32xf32>, vector<32x128xf32>, vector<8x128xf32> -> vector<8x128xf32>
    %277 = vector.broadcast %222 : vector<1x128xf32> to vector<8x128xf32>
    %278 = arith.addf %276, %277 : vector<8x128xf32>
    %cst_83 = arith.constant 5.000000e-01 : f32
    %279 = vector.broadcast %cst_83 : f32 to vector<8x128xf32>
    %280 = arith.mulf %279, %278 : vector<8x128xf32>
    %cst_84 = arith.constant 0.707106769 : f32
    %281 = vector.broadcast %cst_84 : f32 to vector<8x128xf32>
    %282 = arith.mulf %278, %281 : vector<8x128xf32>
    %cst_85 = arith.constant 0.000000e+00 : f32
    %283 = vector.broadcast %cst_85 : f32 to vector<8x128xf32>
    %284 = arith.cmpf oge, %282, %283 : vector<8x128xf32>
    %cst_86 = arith.constant 1.000000e+00 : f32
    %cst_87 = arith.constant -1.000000e+00 : f32
    %285 = vector.broadcast %cst_86 : f32 to vector<8x128xf32>
    %286 = vector.broadcast %cst_87 : f32 to vector<8x128xf32>
    %287 = arith.select %284, %285, %286 : vector<8x128xi1>, vector<8x128xf32>
    %288 = math.absf %282 : vector<8x128xf32>
    %cst_88 = arith.constant 0.327591091 : f32
    %289 = vector.broadcast %cst_88 : f32 to vector<8x128xf32>
    %290 = arith.mulf %289, %288 : vector<8x128xf32>
    %cst_89 = arith.constant 1.000000e+00 : f32
    %291 = vector.broadcast %cst_89 : f32 to vector<8x128xf32>
    %292 = arith.addf %291, %290 : vector<8x128xf32>
    %cst_90 = arith.constant 1.000000e+00 : f32
    %293 = vector.broadcast %cst_90 : f32 to vector<8x128xf32>
    %294 = arith.divf %293, %292 : vector<8x128xf32>
    %cst_91 = arith.constant 1.06140542 : f32
    %295 = vector.broadcast %cst_91 : f32 to vector<8x128xf32>
    %296 = arith.mulf %295, %294 : vector<8x128xf32>
    %cst_92 = arith.constant -1.45315206 : f32
    %297 = vector.broadcast %cst_92 : f32 to vector<8x128xf32>
    %298 = arith.addf %296, %297 : vector<8x128xf32>
    %299 = arith.mulf %298, %294 : vector<8x128xf32>
    %cst_93 = arith.constant 1.42141378 : f32
    %300 = vector.broadcast %cst_93 : f32 to vector<8x128xf32>
    %301 = arith.addf %299, %300 : vector<8x128xf32>
    %302 = arith.mulf %301, %294 : vector<8x128xf32>
    %cst_94 = arith.constant -0.284496725 : f32
    %303 = vector.broadcast %cst_94 : f32 to vector<8x128xf32>
    %304 = arith.addf %302, %303 : vector<8x128xf32>
    %305 = arith.mulf %304, %294 : vector<8x128xf32>
    %cst_95 = arith.constant 0.254829586 : f32
    %306 = vector.broadcast %cst_95 : f32 to vector<8x128xf32>
    %307 = arith.addf %305, %306 : vector<8x128xf32>
    %308 = arith.mulf %307, %294 : vector<8x128xf32>
    %cst_96 = arith.constant 0.000000e+00 : f32
    %309 = vector.broadcast %cst_96 : f32 to vector<8x128xf32>
    %310 = arith.subf %309, %288 : vector<8x128xf32>
    %311 = arith.mulf %310, %288 : vector<8x128xf32>
    %312 = math.exp %311 : vector<8x128xf32>
    %313 = arith.mulf %308, %312 : vector<8x128xf32>
    %cst_97 = arith.constant 1.000000e+00 : f32
    %314 = vector.broadcast %cst_97 : f32 to vector<8x128xf32>
    %315 = arith.subf %314, %313 : vector<8x128xf32>
    %316 = arith.mulf %287, %315 : vector<8x128xf32>
    %cst_98 = arith.constant 1.000000e+00 : f32
    %317 = vector.broadcast %cst_98 : f32 to vector<8x128xf32>
    %318 = arith.addf %317, %316 : vector<8x128xf32>
    %319 = arith.mulf %280, %318 : vector<8x128xf32>
    %cst_99 = arith.constant dense<0.000000e+00> : vector<8x128xf32>
    %320 = tpu.matmul %319, %216, %cst_99 {dimension_numbers = #tpu.dot_dimension_numbers<[1], [0], [0], [1], [0, 0, 1, 1], [], []>} : vector<8x128xf32>, vector<128x128xf32>, vector<8x128xf32> -> vector<8x128xf32>
    %321 = vector.broadcast %223 : vector<1x128xf32> to vector<8x128xf32>
    %322 = arith.addf %320, %321 : vector<8x128xf32>
    %323 = vector.extract_strided_slice %322 {offsets = [0, 0], sizes = [8, 32], strides = [1, 1]} : vector<8x128xf32> to vector<8x32xf32>
    %324 = arith.addf %275, %323 : vector<8x32xf32>
    %cst_100 = arith.constant dense<0.000000e+00> : vector<8xf32>
    %325 = vector.multi_reduction <add>, %324, %cst_100 [1] : vector<8x32xf32> to vector<8xf32>
    %326 = vector.shape_cast %325 : vector<8xf32> to vector<8x1xf32>
    %cst_101 = arith.constant 3.200000e+01 : f32
    %327 = vector.broadcast %cst_101 : f32 to vector<8x1xf32>
    %328 = arith.divf %326, %327 : vector<8x1xf32>
    %329 = vector.broadcast %328 : vector<8x1xf32> to vector<8x32xf32>
    %330 = arith.subf %324, %329 : vector<8x32xf32>
    %331 = arith.mulf %330, %330 : vector<8x32xf32>
    %cst_102 = arith.constant dense<0.000000e+00> : vector<8xf32>
    %332 = vector.multi_reduction <add>, %331, %cst_102 [1] : vector<8x32xf32> to vector<8xf32>
    %333 = vector.shape_cast %332 : vector<8xf32> to vector<8x1xf32>
    %cst_103 = arith.constant 3.200000e+01 : f32
    %334 = vector.broadcast %cst_103 : f32 to vector<8x1xf32>
    %335 = arith.divf %333, %334 : vector<8x1xf32>
    %336 = vector.broadcast %328 : vector<8x1xf32> to vector<8x32xf32>
    %337 = arith.subf %324, %336 : vector<8x32xf32>
    %cst_104 = arith.constant 9.99999974E-6 : f32
    %338 = vector.broadcast %cst_104 : f32 to vector<8x1xf32>
    %339 = arith.addf %335, %338 : vector<8x1xf32>
    %340 = math.rsqrt %339 : vector<8x1xf32>
    %341 = vector.broadcast %340 : vector<8x1xf32> to vector<8x32xf32>
    %342 = arith.mulf %337, %341 : vector<8x32xf32>
    %343 = vector.broadcast %224 : vector<1x32xf32> to vector<8x32xf32>
    %344 = arith.mulf %342, %343 : vector<8x32xf32>
    %345 = vector.broadcast %225 : vector<1x32xf32> to vector<8x32xf32>
    %346 = arith.addf %344, %345 : vector<8x32xf32>
    %c32 = arith.constant 32 : index
    %c0_105 = arith.constant 0 : index
    %347 = vector.load %arg2[%c32, %c0_105] : memref<536x128xf32, #tpu.memory_space<vmem>>, vector<8x128xf32>
    %348 = vector.extract_strided_slice %347 {offsets = [0, 0], sizes = [1, 32], strides = [1, 1]} : vector<8x128xf32> to vector<1x32xf32>
    %349 = vector.extract_strided_slice %347 {offsets = [1, 0], sizes = [1, 32], strides = [1, 1]} : vector<8x128xf32> to vector<1x32xf32>
    %350 = vector.extract_strided_slice %347 {offsets = [2, 0], sizes = [1, 128], strides = [1, 1]} : vector<8x128xf32> to vector<1x128xf32>
    %c40 = arith.constant 40 : index
    %c0_106 = arith.constant 0 : index
    %351 = vector.load %arg2[%c40, %c0_106] : memref<536x128xf32, #tpu.memory_space<vmem>>, vector<32x128xf32>
    %cst_107 = arith.constant dense<0.000000e+00> : vector<8xf32>
    %352 = vector.multi_reduction <add>, %346, %cst_107 [1] : vector<8x32xf32> to vector<8xf32>
    %353 = vector.shape_cast %352 : vector<8xf32> to vector<8x1xf32>
    %cst_108 = arith.constant 3.200000e+01 : f32
    %354 = vector.broadcast %cst_108 : f32 to vector<8x1xf32>
    %355 = arith.divf %353, %354 : vector<8x1xf32>
    %356 = vector.broadcast %355 : vector<8x1xf32> to vector<8x32xf32>
    %357 = arith.subf %346, %356 : vector<8x32xf32>
    %358 = arith.mulf %357, %357 : vector<8x32xf32>
    %cst_109 = arith.constant dense<0.000000e+00> : vector<8xf32>
    %359 = vector.multi_reduction <add>, %358, %cst_109 [1] : vector<8x32xf32> to vector<8xf32>
    %360 = vector.shape_cast %359 : vector<8xf32> to vector<8x1xf32>
    %cst_110 = arith.constant 3.200000e+01 : f32
    %361 = vector.broadcast %cst_110 : f32 to vector<8x1xf32>
    %362 = arith.divf %360, %361 : vector<8x1xf32>
    %363 = vector.broadcast %355 : vector<8x1xf32> to vector<8x32xf32>
    %364 = arith.subf %346, %363 : vector<8x32xf32>
    %cst_111 = arith.constant 9.99999974E-6 : f32
    %365 = vector.broadcast %cst_111 : f32 to vector<8x1xf32>
    %366 = arith.addf %362, %365 : vector<8x1xf32>
    %367 = math.rsqrt %366 : vector<8x1xf32>
    %368 = vector.broadcast %367 : vector<8x1xf32> to vector<8x32xf32>
    %369 = arith.mulf %364, %368 : vector<8x32xf32>
    %370 = vector.broadcast %348 : vector<1x32xf32> to vector<8x32xf32>
    %371 = arith.mulf %369, %370 : vector<8x32xf32>
    %372 = vector.broadcast %349 : vector<1x32xf32> to vector<8x32xf32>
    %373 = arith.addf %371, %372 : vector<8x32xf32>
    %cst_112 = arith.constant dense<0.000000e+00> : vector<8x128xf32>
    %374 = tpu.matmul %373, %351, %cst_112 {dimension_numbers = #tpu.dot_dimension_numbers<[1], [0], [0], [1], [0, 0, 1, 1], [], []>} : vector<8x32xf32>, vector<32x128xf32>, vector<8x128xf32> -> vector<8x128xf32>
    %375 = vector.broadcast %350 : vector<1x128xf32> to vector<8x128xf32>
    %376 = arith.addf %374, %375 : vector<8x128xf32>
    %c0_113 = arith.constant 0 : index
    %c0_114 = arith.constant 0 : index
    %377 = vector.load %arg3[%c0_113, %c0_114] : memref<8x128xf32, #tpu.memory_space<vmem>>, vector<8x128xf32>
    tpu.vector_store %arg3[%c0_113, %c0_114], %376 {strides = array<i32>} : memref<8x128xf32, #tpu.memory_space<vmem>>, vector<8x128xf32>,
    return
  }
  func.func @transform_0(%arg0: i32) -> (i32, i32) {
    %c0_i32 = arith.constant 0 : i32
    %c0_i32_0 = arith.constant 0 : i32
    return %arg0, %c0_i32 : i32, i32
  }
  func.func @transform_1(%arg0: i32) -> (i32, i32) {
    %c0_i32 = arith.constant 0 : i32
    %c0_i32_0 = arith.constant 0 : i32
    %c0_i32_1 = arith.constant 0 : i32
    return %c0_i32, %c0_i32_0 : i32, i32
  }
  func.func @transform_2(%arg0: i32) -> (i32, i32) {
    %c0_i32 = arith.constant 0 : i32
    %c0_i32_0 = arith.constant 0 : i32
    return %arg0, %c0_i32 : i32, i32
  }
}

</mosaic_0001>

<bundles_post_ra>
// kernel: protein_transformer_forward.1
= control target key start
LH: loop header
LB: loop body
LE: loop exit
PB: predicated region body
PF: predicated region fallthrough
CT: control target
= control target key end

     0   :  { %7 = vsyncpa [#allocation3], 0  ;;  %s2421_s9 = smov 0   ;;  %s2748_s0 = inlined_call_operand.vmem [shape: s32[16,1], index: 0, kind: input, shape index: {}]   ;;  %s2749_s1 = inlined_call_operand.hbm [shape: f32[536,128], index: 1, kind: input, shape index: {}]   ;;  %s2750_s2 = inlined_call_operand.vmem [shape: f32[16,128], index: 2, kind: output, shape index: {}]  }
   0x1 LB: > { %s2427_s10 = sadd.s32 4294967295, %s2393_s9   ;;  %p1799_p0 = scmp.ge.s32.totalorder %s2393_s9, 1  ;;  %s2393_s9 = sphi %s2421_s9, %s13_s9  }
   0x2   : > { %p91_p1 = scmp.lt.s32.totalorder %s2393_s9, 3  ;;  %s2395_s11 = smov [#allocation2]  }
   0x3   : > { %s103_s12 = sshll.u32 %s2395_s11, 4  ;;  %p2751_p3 = scmp.eq.s32.totalorder %s2427_s10, 0  ;;  %s104_s12 = int_to_ptr.vmem [resolvable:$true] %s103_s12 }
   0x4   : > { %p2431_p2 = pnand %p1799_p0, %p91_p1  ;;  %s2355_s17 = scalar_lea.hbm %s2749_s1, 8576 }
   0x5   : > { %p2356_p6 = scmp.ne.s32.totalorder %s2749_s1, %s2355_s17  ;;  %p2362_p10 = scmp.lt.u32.totalorder %s2355_s17, %s2749_s1 }
   0x6   : > { %s2753_s13 = scalar_select %p2431_p2, 1, 0 }
   0x7   : > { %p2243_p4 = pneg %p2431_p2 }
   0x9   : > { %p2440_p5 = pnand %p2751_p3, %p2243_p4 }
   0xb   : > { %p2357_p7 = pneg %p2440_p5 }
   0xd   : > { %p2358_p8 = pnand %p2357_p7, %p2356_p6 }
   0xf   : > { %p2359_p9 = pneg %p2358_p8 }
  0x11   : > { %p2364_p11 = pnand %p2362_p10, %p2359_p9 }
  0x13   : > { %2367 = shalt.err (!%p2364_p11)
}
  0x14   : > { %s2368_s22 = scalar_lea.vmem %s104_s12, 8576  ;;  %p2376_p1 = scmp.lt.s32.totalorder %s104_s12, %s104_s12 }
  0x15   : > { %p2369_p12 = scmp.ne.s32.totalorder %s104_s12, %s2368_s22  ;;  %p2377_p4 = scmp.lt.s32.totalorder %s2368_s22, %s2368_s22 }
  0x17   : > { %p2371_p13 = pnand %p2369_p12, %p2357_p7  ;;  %p2378_p3 = por %p2377_p4, %p2376_p1 }
  0x19   : > { %p2372_p0 = pneg %p2371_p13 }
  0x1b   : > { %p2379_p2 = pnand %p2378_p3, %p2372_p0 }
  0x1d   : > { %2382 = shalt.err (!%p2379_p2)
}
  0x1e   : > { %s2396_s23 = smov 128   ;;  %s2397_s24 = smov 8  }
  0x1f   : > { %2246 = dma.hbm_to_vmem [thread:$0]  (!%p2440_p5), %s2749_s1, 8576, %s104_s12, [#allocation3], %s2396_s23, %s2396_s23, %s2397_s24  }
  0x20   : > { %p2755_p6 = scmp.ne.s32.totalorder %s2753_s13, 0 }
  0x21   : > { %p2756_p8 = scmp.eq.s32.totalorder (!%p2755_p6), %s2427_s10, 0 }
  0x22   : > { %126 = sbr.rel (%p2755_p6) target bundleno = 5803 (0x16ab), region = 28 }
  0x29   : > { %2388 = dma.done.wait (%p2756_p8), [#allocation3], 8576   ;;  %p2757_p7 = pmov %p2756_p8 }
  0x2a   : > { %p146_p2 = scmp.lt.s32.totalorder %s2427_s10, 1  ;;  %v2398_v0 = vmov 0   ;;  %v2399_v1 = vmov 0.0|0.0   ;;  %v162_v3 = vld [vmem:[#allocation2] sm:$0xff]  ;;  %v163_v4 = vld [vmem:[#allocation2 + $0x8] sm:$0xff]  ;;  %vm2400_vm0 = vmmov 0   ;;  %v155_v8 = vlaneseq }
  0x2b   : > { %2390 = vsyncadd (%p2757_p7), [#allocation3], 4294958720  ;;  %2268 = vset.pattern.permute.xlu0 %v2398_v0  ;;  %2118 = vmatprep.subr.bf16.mxu0 %v2399_v1  ;;  %v2119_v5 = vpack.c.bf16 %v163_v4, %v162_v3  ;;  %v2401_v6 = vmov 0.0   ;;  %v239_v7 = vld [vmem:[#allocation2 + $0x18] sm:$0xff]  ;;  %s2402_s3 = smov 32   ;;  %vm164_vm1 = vcmask 130048  }
  0x2c   : > { %s2761_s10 = smov (!%p146_p2, %s2427_s10), 1  ;;  %2135 = vmatprep.subr.bf16.mxu1 %v2399_v1  ;;  %1924 = vmatprep.mubr.msk.f32.mxu0 %vm2400_vm0, %v2401_v6  ;;  %v156_v9 = vand.u32 127, %v155_v8  ;;  %v364_v12 = vld [vmem:[#allocation2 + $0x48] sm:$0xff]  ;;  %v365_v13 = vld [vmem:[#allocation2 + $0x50] sm:$0xff]  ;;  %v366_v14 = vld [vmem:[#allocation2 + $0x58] sm:$0xff]  ;;  %s2403_s4 = smov 96  }
  0x2d   : > { %s1804_s27 = sshll.u32 %s2761_s10, 3  ;;  %1957 = vmatprep.mubr.msk.f32.mxu1 %vm2400_vm0, %v2401_v6  ;;  %2120 = vmatpush3.bf16.msra.mxu0 %v2119_v5  ;;  %v2122_v15 = vpack.c.bf16 %v365_v13, %v364_v12  ;;  %v367_v16 = vld [vmem:[#allocation2 + $0x60] sm:$0xff]  ;;  %v238_v28 = vld [vmem:[#allocation2 + $0x10] sm:$0xff]  ;;  %vm397_vm13 = vcmask 261120   ;;  %v2502_v32 = vshrl.u32 %v155_v8, 7  ;;  %v2507_v34 = vld [vmem:[#allocation2 + $0x128] sm:$0xff] }
  0x2e   : > { %s149_s30 = scalar_lea.vmem %s2748_s0, %s1804_s27  ;;  %2121 = vmatprep.subr.bf16.mxu0 %v2399_v1  ;;  %v2125_v17 = vpack.c.bf16 %v367_v16, %v366_v14  ;;  %vm322_vm3 = vcmp.ge.s32.totalorder %v156_v9, 16  ;;  %vm323_vm4 = vcmp.lt.s32.totalorder %v156_v9, 24  ;;  %vm349_vm5 = vcmp.ge.s32.totalorder %v156_v9, 24  ;;  %s2404_s5 = smov 64   ;;  %vm2529_vm14 = vmpackc.low %vm397_vm13, %vm397_vm13 }
  0x2f   : > { %v154_v2 = vld [vmem:[%s149_s30] sm:$0xff]  ;;  %vm350_vm6 = vcmp.lt.s32.totalorder %v156_v9, 32  ;;  %vm324_vm7 = vmand %vm322_vm3, %vm323_vm4  ;;  %vm295_vm9 = vcmp.ge.s32.totalorder %v156_v9, 8  ;;  %vm296_vm10 = vcmp.lt.s32.totalorder %v156_v9, 16  ;;  %vm269_vm11 = vcmp.lt.s32.totalorder %v156_v9, 8  ;;  %s153_s8 = scalar_lea.vmem %s2750_s2, %s1804_s27 }
  0x30   : > { %158 = vperm.xlu0 %2268, %v154_v2   ;;  %v331_v18 = vsel %vm324_vm7, 1.0, %v2401_v6  ;;  %vm351_vm8 = vmand %vm349_vm5, %vm350_vm6  ;;  %v275_v23 = vsel %vm269_vm11, 1.0, %v2401_v6  ;;  %v2505_v33 = vsub.s32 0, %v2502_v32 }
  0x31   : > { %v359_v19 = vsel %vm351_vm8, 1.0, %v2401_v6  ;;  %vm297_vm12 = vmand %vm295_vm9, %vm296_vm10 }
  0x32   : > { %v2274_v20 = vpack.i.bf16 %v359_v19, %v331_v18  ;;  %v303_v24 = vsel %vm297_vm12, 1.0, %v2401_v6  ;;  %v396_v37 = vrot.slane %v2507_v34, %v2505_v33 }
  0x33   : > { %v2269_v27 = vpack.i.bf16 %v303_v24, %v275_v23 }
  0x34   : > { %242 = vrot.lane.b32.xlu0 %v239_v7, %s2402_s3 }
  0x38   : > { %2275 = vrot.lane.b32.xlu0 %v2274_v20, %s2402_s3 }
  0xaf   : > { %v159_v10 = vpop.permute.xlu0 %158 }
  0xb0   : > { %vm160_vm2 = vcmp.eq.s32.totalorder %v159_v10, %v156_v9 }
  0xb1   : > { %v161_v11 = vsel %vm160_vm2, 1.0, %v2401_v6 }
  0xb2   : > { %1925 = vmatmul.mubr.msk.f32.vlgmr.msra.gmra.mrb[0].mxu0 %vm164_vm1, %v161_v11 }
  0xb3   : > { %1935 = vmatprep.mubr.msk.f32.mxu0 %vm2400_vm0, %v2401_v6  ;;  %2123 = vmatpush3.bf16.msra.mxu0 %v2122_v15  ;;  %v243_v21 = vpop.permute.xlu0 %242 }
  0xb4   : > { %2124 = vmatprep.subr.bf16.mxu0 %v2399_v1 }
  0xb7   : > { %2126 = vmatpush3.bf16.msra.mxu0 %v2125_v17  ;;  %v2276_v36 = vpop.permute.xlu0 %2275 }
  0xb8   : > { %2127 = vmatprep.subr.bf16.mxu0 %v2399_v1  ;;  %v2515_v40 = vunpack.i.h.bf16 %v2276_v36  ;;  %v2517_v41 = vunpack.i.l.bf16 %v2276_v36 }
 0x185   : > { %v234_v22 = vpop.f32.mrb[0].mxu0 }
 0x186   : > { %v245_v25 = vmul.f32 %v243_v21, %v234_v22  ;;  %v1926_v26 = vpop.f32.mrb[1].mxu0  ;;  %v240_v29 = vmul.f32 %v238_v28, %v234_v22 }
 0x188   : > { %247 = vrot.lane.b32.xlu1 %v245_v25, %s2403_s4 }
 0x18c   : > { %2270 = vrot.lane.b32.xlu1 %v2269_v27, %s2402_s3 }
 0x1fa   : > { %v248_v30 = vpop.permute.xlu1 %247 }
 0x1fb   : > { %v2496_v31 = vadd.f32 %v248_v30, %v240_v29  ;;  %v368_v30 = vld [vmem:[#allocation2 + $0x68] sm:$0xff] }
 0x1fd   : > { %1936 = vmatmul.mubr.msk.f32.vlgmr.msra.gmra.mrb[2].mxu0 %vm397_vm13, %v2496_v31 }
 0x1fe   : > { %1946 = vmatprep.mubr.msk.f32.mxu0 %vm2400_vm0, %v2401_v6  ;;  %v2271_v35 = vpop.permute.xlu1 %2270 }
 0x1ff   : > { %v2511_v38 = vunpack.i.h.bf16 %v2271_v35  ;;  %v2513_v39 = vunpack.i.l.bf16 %v2271_v35  ;;  %v369_v35 = vld [vmem:[#allocation2 + $0x70] sm:$0xff] }
 0x200   : > { %v2142_v36 = vpack.c.bf16 %v369_v35, %v368_v30  ;;  %v382_v35 = vld [vmem:[#allocation2 + $0xd8] sm:$0xff] }
 0x2d0   : > { %v467_v42 = vpop.f32.mrb[2].mxu0 }
 0x2d1   : > { %v468_v43 = vadd.f32 %v467_v42, %v396_v37  ;;  %v1937_v44 = vpop.f32.mrb[3].mxu0  ;;  %v370_v37 = vld [vmem:[#allocation2 + $0x78] sm:$0xff]  ;;  %v371_v42 = vld [vmem:[#allocation2 + $0x80] sm:$0xff] }
 0x2d3   : > { %v487_v45 = vmul.f32 %v2513_v39, %v468_v43  ;;  %v488_v46 = vmul.f32 %v2511_v38, %v468_v43  ;;  %v489_v47 = vmul.f32 %v2517_v41, %v468_v43  ;;  %v490_v48 = vmul.f32 %v2515_v40, %v468_v43 }
 0x2d5   : > { %v2279_v49 = vpack.i.bf16 %v488_v46, %v487_v45  ;;  %v2284_v50 = vpack.i.bf16 %v490_v48, %v489_v47 }
 0x2d7   : > { %2280 = vrot.lane.b32.xlu1 %v2279_v49, %s2403_s4  ;;  %2285 = vrot.lane.b32.xlu0 %v2284_v50, %s2403_s4  ;;  %v2581_v49 = vsub.s32 1, %v2502_v32 }
 0x2d9   : > { %v709_v50 = vrot.slane %v2507_v34, %v2581_v49 }
 0x2db   : > { %2290 = vrot.lane.b32.xlu1 %v2269_v27, %s2404_s5  ;;  %2295 = vrot.lane.b32.xlu0 %v2274_v20, %s2404_s5 }
 0x349   : > { %v2281_v51 = vpop.permute.xlu1 %2280  ;;  %v2286_v52 = vpop.permute.xlu0 %2285 }
 0x34a   : > { %v2283_v53 = vunpack.i.h.bf16 %v2281_v51  ;;  %v2282_v54 = vunpack.i.l.bf16 %v2281_v51  ;;  %v2288_v63 = vunpack.i.h.bf16 %v2286_v52  ;;  %v2287_v0 = vunpack.i.l.bf16 %v2286_v52 }
 0x34c   : > { %v2128_v56 = vpack.c.bf16 %v2283_v53, %v2282_v54  ;;  %v2132_v8 = vpack.c.bf16 %v2288_v63, %v2287_v0 }
 0x34d   : > { %v2533_v57 = vpop.permute.xlu1 %2290  ;;  %v2535_v58 = vpop.permute.xlu0 %2295 }
 0x34e   : > { %v2293_v59 = vunpack.i.h.bf16 %v2533_v57  ;;  %v2292_v60 = vunpack.i.l.bf16 %v2533_v57  ;;  %v2298_v61 = vunpack.i.h.bf16 %v2535_v58  ;;  %v2297_v62 = vunpack.i.l.bf16 %v2535_v58  ;;  %2130 = vmatpush3.bf16.xpose.msk.msra.mxu0 %vm2529_vm14, %v2128_v56 }
 0x34f   : > { %2131 = vmatprep.subr.bf16.mxu0 %v2399_v1 }
 0x350   : > { %v504_v2 = vmul.f32 %v2293_v59, %v468_v43  ;;  %v503_v3 = vmul.f32 %v2292_v60, %v468_v43  ;;  %v506_v4 = vmul.f32 %v2298_v61, %v468_v43  ;;  %v505_v5 = vmul.f32 %v2297_v62, %v468_v43 }
 0x352   : > { %v2299_v7 = vpack.i.bf16 %v504_v2, %v503_v3  ;;  %v2304_v9 = vpack.i.bf16 %v506_v4, %v505_v5  ;;  %v372_v5 = vld [vmem:[#allocation2 + $0x88] sm:$0xff] }
 0x354   : > { %2300 = vrot.lane.b32.xlu0 %v2299_v7, %s2404_s5  ;;  %v373_v7 = vld [vmem:[#allocation2 + $0x90] sm:$0xff] }
 0x356   : > { %2134 = vmatpush3.bf16.xpose.msk.msra.mxu0 %vm2529_vm14, %v2132_v8  ;;  %v2148_v8 = vpack.c.bf16 %v373_v7, %v372_v5 }
 0x357   : > { %2147 = vmatprep.subr.bf16.mxu0 %v2399_v1 }
 0x358   : > { %2305 = vrot.lane.b32.xlu0 %v2304_v9, %s2404_s5  ;;  %v374_v9 = vld [vmem:[#allocation2 + $0x98] sm:$0xff] }
 0x35d   : > { %1947 = vmatmul.mubr.msk.f32.vlgmr.msra.gmra.mrb[4].mxu0 %vm397_vm13, %v468_v43  ;;  %v2145_v43 = vpack.c.bf16 %v371_v42, %v370_v37  ;;  %v384_v42 = vld [vmem:[#allocation2 + $0xe8] sm:$0xff] }
 0x35e   : > { %1979 = vmatprep.mubr.msk.f32.mxu0 %vm2400_vm0, %v2401_v6  ;;  %2149 = vmatpush3.bf16.msra.mxu0 %v2148_v8 }
 0x35f   : > { %2150 = vmatprep.subr.bf16.mxu0 %v2399_v1 }
 0x3c6   : > { %v2301_v10 = vpop.permute.xlu0 %2300 }
 0x3c7   : > { %v2303_v11 = vunpack.i.h.bf16 %v2301_v10  ;;  %v2302_v12 = vunpack.i.l.bf16 %v2301_v10  ;;  %v375_v10 = vld [vmem:[#allocation2 + $0xa0] sm:$0xff] }
 0x3c9   : > { %v523_v13 = vsel %vm397_vm13, %v2302_v12, %v2513_v39  ;;  %v524_v14 = vsel %vm397_vm13, %v2303_v11, %v2511_v38  ;;  %v2151_v11 = vpack.c.bf16 %v375_v10, %v374_v9 }
 0x3ca   : > { %v2306_v15 = vpop.permute.xlu0 %2305  ;;  %v2136_v16 = vpack.c.bf16 %v524_v14, %v523_v13  ;;  %v2591_v14 = vsub.s32 2, %v2502_v32 }
 0x3cb   : > { %v2308_v17 = vunpack.i.h.bf16 %v2306_v15  ;;  %v2307_v18 = vunpack.i.l.bf16 %v2306_v15  ;;  %2152 = vmatpush3.bf16.msra.mxu0 %v2151_v11  ;;  %v805_v15 = vsub.s32 3, %v2502_v32 }
 0x3cc   : > { %2137 = vmatpush3.bf16.msra.mxu1 %v2136_v16  ;;  %2177 = vmatprep.subr.bf16.mxu0 %v2399_v1  ;;  %v801_v16 = vrot.slane %v2507_v34, %v2591_v14 }
 0x3cd   : > { %2138 = vmatprep.subr.bf16.mxu1 %v2399_v1  ;;  %v525_v19 = vsel %vm397_vm13, %v2307_v18, %v2517_v41  ;;  %v526_v20 = vsel %vm397_vm13, %v2308_v17, %v2515_v40 }
 0x3ce   : > { %v2139_v21 = vpack.c.bf16 %v526_v20, %v525_v19  ;;  %v806_v19 = vrot.slane %v2507_v34, %v805_v15 }
 0x3d0   : > { %2140 = vmatpush3.bf16.msra.mxu1 %v2139_v21 }
 0x3d1   : > { %2141 = vmatprep.subr.bf16.mxu1 %v2399_v1 }
 0x430   : > { %v616_v22 = vpop.f32.mrb[4].mxu0 }
 0x431   : > { %v620_v23 = vmul.f32 0.35355338, %v616_v22  ;;  %v1948_v24 = vpop.f32.mrb[5].mxu0  ;;  %v376_v22 = vld [vmem:[#allocation2 + $0xa8] sm:$0xff] }
 0x433   : > { %v621_v25 = vsel %vm397_vm13, %v620_v23, -inf }
 0x434   : > { %622 = vmax.xlane.f32.xlu1 %v621_v25  ;;  %v378_v25 = vld [vmem:[#allocation2 + $0xb8] sm:$0xff] }
 0x4c1   : > { %v623_v26 = vpop.xlane.xlu1 %622 }
 0x4c2   : > { %v624_v27 = vsub.f32 %v620_v23, %v623_v26  ;;  %v377_v23 = vld [vmem:[#allocation2 + $0xb0] sm:$0xff]  ;;  %v379_v26 = vld [vmem:[#allocation2 + $0xc0] sm:$0xff] }
 0x4c3   : > { %v2154_v24 = vpack.c.bf16 %v377_v23, %v376_v22 }
 0x4c4   : > { %v625_v28 = vmul.f32 1.442695, %v624_v27  ;;  %v2157_v27 = vpack.c.bf16 %v379_v26, %v378_v25 }
 0x4c6   : > { %2329 = vpow2.f32 %v625_v28  ;;  %v380_v28 = vld [vmem:[#allocation2 + $0xc8] sm:$0xff] }
 0x4d0   : > { %v2330_v29 = vpop.eup %2329 }
 0x4d1   : > { %1958 = vmatmul.mubr.msk.f32.vlgmr.msra.gmra.mrb[0].mxu1 %vm397_vm13, %v2330_v29  ;;  %v381_v29 = vld [vmem:[#allocation2 + $0xd0] sm:$0xff] }
 0x4d2   : > { %1968 = vmatprep.mubr.msk.f32.mxu1 %vm2400_vm0, %v2401_v6  ;;  %2143 = vmatpush3.bf16.msra.mxu1 %v2142_v36  ;;  %v2160_v30 = vpack.c.bf16 %v381_v29, %v380_v28  ;;  %v383_v36 = vld [vmem:[#allocation2 + $0xe0] sm:$0xff] }
 0x4d3   : > { %2144 = vmatprep.subr.bf16.mxu1 %v2399_v1  ;;  %v2163_v37 = vpack.c.bf16 %v383_v36, %v382_v35 }
 0x4d6   : > { %2146 = vmatpush3.bf16.msra.mxu1 %v2145_v43  ;;  %v385_v43 = vld [vmem:[#allocation2 + $0xf0] sm:$0xff] }
 0x4d7   : > { %2153 = vmatprep.subr.bf16.mxu1 %v2399_v1 }
 0x5a4   : > { %v696_v44 = vpop.f32.mrb[0].mxu1 }
 0x5a5   : > { %701 = vrot.lane.b32.xlu0 %v696_v44, %s2403_s4  ;;  %v1959_v45 = vpop.f32.mrb[1].mxu1 }
 0x5a6   : > { %v386_v45 = vld [vmem:[#allocation2 + $0xf8] sm:$0xff] }
 0x617   : > { %v702_v46 = vpop.permute.xlu0 %701 }
 0x618   : > { %2331 = vrcp.f32 %v702_v46  ;;  %v387_v46 = vld [vmem:[#allocation2 + $0x100] sm:$0xff] }
 0x622   : > { %v2332_v47 = vpop.eup %2331 }
 0x623   : > { %v705_v48 = vmul.f32 %v2332_v47, %v696_v44  ;;  %v2166_v44 = vpack.c.bf16 %v385_v43, %v384_v42  ;;  %v2169_v47 = vpack.c.bf16 %v387_v46, %v386_v45 }
 0x625   : > { %1969 = vmatmul.mubr.msk.f32.vlgmr.msra.gmra.mrb[2].mxu1 %vm397_vm13, %v705_v48  ;;  %v388_v48 = vld [vmem:[#allocation2 + $0x108] sm:$0xff] }
 0x626   : > { %2014 = vmatprep.mubr.msk.f32.mxu1 %vm2400_vm0, %v2401_v6  ;;  %2155 = vmatpush3.bf16.msra.mxu1 %v2154_v24 }
 0x627   : > { %2156 = vmatprep.subr.bf16.mxu1 %v2399_v1 }
 0x62a   : > { %2158 = vmatpush3.bf16.msra.mxu1 %v2157_v27  ;;  %v2405_v27 = vmov -1.0  }
 0x62b   : > { %2159 = vmatprep.subr.bf16.mxu1 %v2399_v1 }
 0x62e   : > { %2161 = vmatpush3.bf16.msra.mxu1 %v2160_v30 }
 0x62f   : > { %2162 = vmatprep.subr.bf16.mxu1 %v2399_v1 }
 0x632   : > { %2164 = vmatpush3.bf16.msra.mxu1 %v2163_v37  ;;  %v914_v37 = vsub.s32 5, %v2502_v32 }
 0x633   : > { %2165 = vmatprep.subr.bf16.mxu1 %v2399_v1 }
 0x634   : > { %v915_v42 = vrot.slane %v2507_v34, %v914_v37 }
 0x636   : > { %2167 = vmatpush3.bf16.msra.mxu1 %v2166_v44 }
 0x637   : > { %2168 = vmatprep.subr.bf16.mxu1 %v2399_v1 }
 0x63a   : > { %2170 = vmatpush3.bf16.msra.mxu1 %v2169_v47 }
 0x63b   : > { %2171 = vmatprep.subr.bf16.mxu1 %v2399_v1 }
 0x6f8   : > { %v779_v51 = vpop.f32.mrb[2].mxu1 }
 0x6f9   : > { %v780_v52 = vadd.f32 %v779_v51, %v709_v50  ;;  %v1970_v53 = vpop.f32.mrb[3].mxu1  ;;  %v389_v50 = vld [vmem:[#allocation2 + $0x110] sm:$0xff] }
 0x6fa   : > { %v2172_v51 = vpack.c.bf16 %v389_v50, %v388_v48  ;;  %v391_v53 = vld [vmem:[#allocation2 + $0x120] sm:$0xff] }
 0x6fb   : > { %v783_v54 = vadd.f32 %v780_v52, %v2496_v31  ;;  %v390_v52 = vld [vmem:[#allocation2 + $0x118] sm:$0xff] }
 0x6fc   : > { %2173 = vmatpush3.bf16.msra.mxu1 %v2172_v51 }
 0x6fd   : > { %v784_v56 = vsel %vm397_vm13, %v783_v54, 0.0  ;;  %2174 = vmatprep.subr.bf16.mxu1 %v2399_v1 }
 0x6fe   : > { %785 = vadd.xlane.f32.xlu0 %v784_v56  ;;  %v810_v56 = vsub.s32 4, %v2502_v32 }
 0x78b   : > { %v786_v63 = vpop.xlane.xlu0 %785 }
 0x78c   : > { %v788_v0 = vmul.f32 0.03125, %v786_v63  ;;  %v811_v63 = vrot.slane %v2507_v34, %v810_v56 }
 0x78e   : > { %v789_v2 = vsub.f32 %v783_v54, %v788_v0  ;;  %v2175_v54 = vpack.c.bf16 %v391_v53, %v390_v52 }
 0x790   : > { %v790_v3 = vmul.f32 %v789_v2, %v789_v2  ;;  %2176 = vmatpush3.bf16.msra.mxu1 %v2175_v54  ;;  %v1010_v54 = vld [vmem:[#allocation2 + $0x130] sm:$0xff] }
 0x791   : > { %2197 = vmatprep.subr.bf16.mxu1 %v2399_v1 }
 0x792   : > { %v791_v4 = vsel %vm397_vm13, %v790_v3, 0.0 }
 0x793   : > { %792 = vadd.xlane.f32.xlu1 %v791_v4 }
 0x820   : > { %v793_v31 = vpop.xlane.xlu1 %792 }
 0x821   : > { %v794_v12 = vmul.f32 0.03125, %v793_v31 }
 0x823   : > { %v795_v13 = vadd.f32 1e-05, %v794_v12 }
 0x825   : > { %2333 = vrsqrt.f32 %v795_v13 }
 0x82f   : > { %v2334_v17 = vpop.eup %2333 }
 0x830   : > { %v797_v18 = vmul.f32 %v2334_v17, %v789_v2 }
 0x832   : > { %v802_v20 = vmul.f32 %v801_v16, %v797_v18 }
 0x834   : > { %v2599_v21 = vadd.f32 %v806_v19, %v802_v20 }
 0x836   : > { %1980 = vmatmul.mubr.msk.f32.vlgmr.msra.gmra.mrb[6].mxu0 %vm397_vm13, %v2599_v21 }
 0x837   : > { %2025 = vmatprep.mubr.msk.f32.mxu0 %vm2400_vm0, %v2401_v6 }
 0x909   : > { %v881_v0 = vpop.f32.mrb[6].mxu0 }
 0x90a   : > { %v882_v2 = vadd.f32 %v881_v0, %v811_v63  ;;  %v1981_v3 = vpop.f32.mrb[7].mxu0  ;;  %v1011_v63 = vld [vmem:[#allocation2 + $0x138] sm:$0xff] }
 0x90b   : > { %v2178_v0 = vpack.c.bf16 %v1011_v63, %v1010_v54  ;;  %v1013_v3 = vld [vmem:[#allocation2 + $0x148] sm:$0xff] }
 0x90c   : > { %v886_v4 = vmul.f32 0.70710677, %v882_v2  ;;  %v885_v30 = vmul.f32 0.5, %v882_v2  ;;  %v1012_v2 = vld [vmem:[#allocation2 + $0x140] sm:$0xff] }
 0x90d   : > { %2179 = vmatpush3.bf16.msra.mxu0 %v2178_v0 }
 0x90e   : > { %v889_v5 = vand.u32 2147483647, %v886_v4  ;;  %vm887_vm15 = vcmp.ge.f32.partialorder %v886_v4, 0.0  ;;  %2180 = vmatprep.subr.bf16.mxu0 %v2399_v1  ;;  %v2181_v4 = vpack.c.bf16 %v1013_v3, %v1012_v2 }
 0x90f   : > { %v888_v28 = vsel %vm887_vm15, 1.0, %v2405_v27 }
 0x910   : > { %v890_v7 = vmul.f32 0.3275911, %v889_v5  ;;  %v903_v9 = vsub.f32 0.0, %v889_v5 }
 0x911   : > { %2182 = vmatpush3.bf16.msra.mxu0 %v2181_v4 }
 0x912   : > { %v891_v8 = vadd.f32 1.0, %v890_v7  ;;  %v904_v11 = vmul.f32 %v903_v9, %v889_v5  ;;  %2183 = vmatprep.subr.bf16.mxu0 %v2399_v1  ;;  %v1007_v9 = vsub.s32 7, %v2502_v32 }
 0x914   : > { %2335 = vrcp.f32 %v891_v8  ;;  %v905_v13 = vmul.f32 1.442695, %v904_v11  ;;  %v1002_v8 = vsub.s32 6, %v2502_v32  ;;  %v1629_v32 = vld [vmem:[#allocation2 + $0x38] sm:$0xff] }
 0x916   : > { %2337 = vpow2.f32 %v905_v13 }
 0x91e   : > { %v2336_v10 = vpop.eup %2335 }
 0x91f   : > { %v894_v31 = vmul.f32 1.0614054, %v2336_v10 }
 0x920   : > { %v2338_v24 = vpop.eup %2337 }
 0x921   : > { %v895_v12 = vadd.f32 -1.4531521, %v894_v31 }
 0x923   : > { %v896_v16 = vmul.f32 %v2336_v10, %v895_v12  ;;  %v1008_v12 = vrot.slane %v2507_v34, %v1007_v9 }
 0x925   : > { %v897_v17 = vadd.f32 1.4214138, %v896_v16 }
 0x927   : > { %v898_v18 = vmul.f32 %v2336_v10, %v897_v17  ;;  %v2643_v17 = vld [vmem:[#allocation2 + $0x210] sm:$0xff] }
 0x929   : > { %v899_v19 = vadd.f32 -0.28449672, %v898_v18  ;;  %v1042_v18 = vrot.slane %v2643_v17, %v2505_v33 }
 0x92b   : > { %v900_v20 = vmul.f32 %v2336_v10, %v899_v19 }
 0x92d   : > { %v901_v22 = vadd.f32 0.2548296, %v900_v20 }
 0x92f   : > { %v902_v23 = vmul.f32 %v2336_v10, %v901_v22  ;;  %v1003_v10 = vrot.slane %v2507_v34, %v1002_v8 }
 0x931   : > { %v907_v25 = vmul.f32 %v2338_v24, %v902_v23 }
 0x933   : > { %v908_v26 = vsub.f32 1.0, %v907_v25 }
 0x935   : > { %v909_v29 = vmul.f32 %v908_v26, %v888_v28 }
 0x937   : > { %v910_v35 = vadd.f32 1.0, %v909_v29 }
 0x939   : > { %v911_v36 = vmul.f32 %v910_v35, %v885_v30 }
 0x93b   : > { %2015 = vmatmul.mubr.f32.vlgmr.msra.gmra.mrb[4].mxu1 %v911_v36 }
 0x93c   : > { %2058 = vmatprep.mubr.msk.f32.mxu1 %vm2400_vm0, %v2401_v6 }
 0xa0e   : > { %v982_v43 = vpop.f32.mrb[4].mxu1 }
 0xa0f   : > { %v983_v44 = vadd.f32 %v982_v43, %v915_v42  ;;  %v2016_v45 = vpop.f32.mrb[5].mxu1 }
 0xa11   : > { %v986_v46 = vadd.f32 %v983_v44, %v2599_v21 }
 0xa13   : > { %v987_v47 = vsel %vm397_vm13, %v986_v46, 0.0 }
 0xa14   : > { %988 = vadd.xlane.f32.xlu1 %v987_v47 }
 0xaa1   : > { %v989_v48 = vpop.xlane.xlu1 %988 }
 0xaa2   : > { %v990_v50 = vmul.f32 0.03125, %v989_v48 }
 0xaa4   : > { %v991_v51 = vsub.f32 %v986_v46, %v990_v50 }
 0xaa6   : > { %v992_v52 = vmul.f32 %v991_v51, %v991_v51 }
 0xaa8   : > { %v993_v53 = vsel %vm397_vm13, %v992_v52, 0.0 }
 0xaa9   : > { %994 = vadd.xlane.f32.xlu1 %v993_v53 }
 0xb36   : > { %v995_v21 = vpop.xlane.xlu1 %994 }
 0xb37   : > { %v996_v5 = vmul.f32 0.03125, %v995_v21 }
 0xb39   : > { %v997_v7 = vadd.f32 1e-05, %v996_v5 }
 0xb3b   : > { %2339 = vrsqrt.f32 %v997_v7  ;;  %v1014_v7 = vld [vmem:[#allocation2 + $0x150] sm:$0xff] }
 0xb45   : > { %v2340_v11 = vpop.eup %2339 }
 0xb46   : > { %v999_v31 = vmul.f32 %v2340_v11, %v991_v51 }
 0xb48   : > { %v1004_v13 = vmul.f32 %v1003_v10, %v999_v31  ;;  %v1015_v10 = vld [vmem:[#allocation2 + $0x158] sm:$0xff]  ;;  %v1016_v31 = vld [vmem:[#allocation2 + $0x160] sm:$0xff] }
 0xb49   : > { %v2198_v11 = vpack.c.bf16 %v1015_v10, %v1014_v7  ;;  %v1033_v7 = vld [vmem:[#allocation2 + $0x1e8] sm:$0xff] }
 0xb4a   : > { %v2637_v16 = vadd.f32 %v1008_v12, %v1004_v13  ;;  %v1017_v12 = vld [vmem:[#allocation2 + $0x168] sm:$0xff] }
 0xb4b   : > { %2199 = vmatpush3.bf16.msra.mxu1 %v2198_v11  ;;  %v2201_v13 = vpack.c.bf16 %v1017_v12, %v1016_v31  ;;  %v1034_v11 = vld [vmem:[#allocation2 + $0x1f0] sm:$0xff]  ;;  %v1035_v31 = vld [vmem:[#allocation2 + $0x1f8] sm:$0xff] }
 0xb4c   : > { %2026 = vmatmul.mubr.msk.f32.vlgmr.msra.gmra.mrb[8].mxu0 %vm397_vm13, %v2637_v16  ;;  %2200 = vmatprep.subr.bf16.mxu1 %v2399_v1  ;;  %v2228_v12 = vpack.c.bf16 %v1035_v31, %v1034_v11 }
 0xb4d   : > { %2036 = vmatprep.mubr.msk.f32.mxu0 %vm2400_vm0, %v2401_v6 }
 0xb4f   : > { %2202 = vmatpush3.bf16.msra.mxu1 %v2201_v13  ;;  %v1036_v13 = vld [vmem:[#allocation2 + $0x200] sm:$0xff] }
 0xb50   : > { %2209 = vmatprep.subr.bf16.mxu1 %v2399_v1 }
 0xc1f   : > { %v1112_v19 = vpop.f32.mrb[8].mxu0 }
 0xc20   : > { %v1113_v20 = vadd.f32 %v1112_v19, %v1042_v18  ;;  %v2027_v22 = vpop.f32.mrb[9].mxu0 }
 0xc22   : > { %v1118_v23 = vmul.f32 %v2517_v41, %v1113_v20  ;;  %v1119_v34 = vmul.f32 %v2515_v40, %v1113_v20  ;;  %v1116_v24 = vmul.f32 %v2513_v39, %v1113_v20  ;;  %v1117_v25 = vmul.f32 %v2511_v38, %v1113_v20 }
 0xc23   : > { %v1120_v29 = vmul.f32 %v2292_v60, %v1113_v20  ;;  %v1121_v30 = vmul.f32 %v2293_v59, %v1113_v20  ;;  %v1122_v36 = vmul.f32 %v2297_v62, %v1113_v20  ;;  %v1123_v42 = vmul.f32 %v2298_v61, %v1113_v20 }
 0xc24   : > { %v2314_v26 = vpack.i.bf16 %v1119_v34, %v1118_v23  ;;  %v2309_v28 = vpack.i.bf16 %v1117_v25, %v1116_v24  ;;  %v1326_v34 = vrot.slane %v2643_v17, %v2581_v49 }
 0xc25   : > { %v2319_v35 = vpack.i.bf16 %v1121_v30, %v1120_v29  ;;  %v2324_v43 = vpack.i.bf16 %v1123_v42, %v1122_v36 }
 0xc26   : > { %2315 = vrot.lane.b32.xlu1 %v2314_v26, %s2403_s4  ;;  %2310 = vrot.lane.b32.xlu0 %v2309_v28, %s2403_s4 }
 0xc2a   : > { %2320 = vrot.lane.b32.xlu0 %v2319_v35, %s2404_s5 }
 0xc2e   : > { %2325 = vrot.lane.b32.xlu0 %v2324_v43, %s2404_s5 }
 0xc98   : > { %v2311_v60 = vpop.permute.xlu0 %2310  ;;  %v2316_v45 = vpop.permute.xlu1 %2315 }
 0xc99   : > { %v2313_v44 = vunpack.i.h.bf16 %v2311_v60  ;;  %v2312_v57 = vunpack.i.l.bf16 %v2311_v60  ;;  %v2318_v46 = vunpack.i.h.bf16 %v2316_v45  ;;  %v2317_v62 = vunpack.i.l.bf16 %v2316_v45  ;;  %v1018_v60 = vld [vmem:[#allocation2 + $0x170] sm:$0xff]  ;;  %v1021_v45 = vld [vmem:[#allocation2 + $0x188] sm:$0xff] }
 0xc9b   : > { %v2184_v59 = vpack.c.bf16 %v2313_v44, %v2312_v57  ;;  %v2188_v58 = vpack.c.bf16 %v2318_v46, %v2317_v62  ;;  %v1019_v44 = vld [vmem:[#allocation2 + $0x178] sm:$0xff] }
 0xc9c   : > { %v2321_v47 = vpop.permute.xlu0 %2320  ;;  %v2204_v57 = vpack.c.bf16 %v1019_v44, %v1018_v60 }
 0xc9d   : > { %2186 = vmatpush3.bf16.xpose.msk.msra.mxu0 %vm2529_vm14, %v2184_v59  ;;  %v2323_v61 = vunpack.i.h.bf16 %v2321_v47  ;;  %v2322_v48 = vunpack.i.l.bf16 %v2321_v47  ;;  %v1020_v59 = vld [vmem:[#allocation2 + $0x180] sm:$0xff] }
 0xc9e   : > { %2187 = vmatprep.subr.bf16.mxu0 %v2399_v1  ;;  %v2207_v46 = vpack.c.bf16 %v1021_v45, %v1020_v59 }
 0xc9f   : > { %v1141_v51 = vsel %vm397_vm13, %v2323_v61, %v2511_v38  ;;  %v1140_v52 = vsel %vm397_vm13, %v2322_v48, %v2513_v39 }
 0xca0   : > { %v2326_v50 = vpop.permute.xlu0 %2325  ;;  %v2192_v63 = vpack.c.bf16 %v1141_v51, %v1140_v52 }
 0xca1   : > { %v2328_v53 = vunpack.i.h.bf16 %v2326_v50  ;;  %v2327_v54 = vunpack.i.l.bf16 %v2326_v50  ;;  %v1422_v50 = vrot.slane %v2643_v17, %v805_v15  ;;  %v1026_v15 = vld [vmem:[#allocation2 + $0x1b0] sm:$0xff] }
 0xca3   : > { %v1143_v0 = vsel %vm397_vm13, %v2328_v53, %v2515_v40  ;;  %v1142_v2 = vsel %vm397_vm13, %v2327_v54, %v2517_v41  ;;  %v1022_v53 = vld [vmem:[#allocation2 + $0x190] sm:$0xff]  ;;  %v1023_v54 = vld [vmem:[#allocation2 + $0x198] sm:$0xff] }
 0xca4   : > { %v2195_v38 = vpack.c.bf16 %v1143_v0, %v1142_v2  ;;  %v1024_v0 = vld [vmem:[#allocation2 + $0x1a0] sm:$0xff]  ;;  %v1025_v2 = vld [vmem:[#allocation2 + $0x1a8] sm:$0xff] }
 0xca5   : > { %2190 = vmatpush3.bf16.xpose.msk.msra.mxu0 %vm2529_vm14, %v2188_v58  ;;  %v1417_v58 = vrot.slane %v2643_v17, %v2591_v14 }
 0xca6   : > { %2191 = vmatprep.subr.bf16.mxu0 %v2399_v1 }
 0xcac   : > { %2037 = vmatmul.mubr.msk.f32.vlgmr.msra.gmra.mrb[10].mxu0 %vm397_vm13, %v1113_v20 }
 0xcad   : > { %2193 = vmatpush3.bf16.msra.mxu0 %v2192_v63  ;;  %2047 = vmatprep.mubr.msk.f32.mxu0 %vm2400_vm0, %v2401_v6  ;;  %v2210_v63 = vpack.c.bf16 %v1023_v54, %v1022_v53  ;;  %v1531_v53 = vrot.slane %v2643_v17, %v914_v37  ;;  %v1619_v37 = vrot.slane %v2643_v17, %v1002_v8  ;;  %v1628_v8 = vld [vmem:[#allocation2 + $0x30] sm:$0xff] }
 0xcae   : > { %2194 = vmatprep.subr.bf16.mxu0 %v2399_v1 }
 0xcb1   : > { %2196 = vmatpush3.bf16.msra.mxu0 %v2195_v38  ;;  %v2213_v38 = vpack.c.bf16 %v1025_v2, %v1024_v0 }
 0xcb2   : > { %2203 = vmatprep.subr.bf16.mxu0 %v2399_v1 }
 0xd7f   : > { %v1233_v39 = vpop.f32.mrb[10].mxu0 }
 0xd80   : > { %v1237_v55 = vmul.f32 0.35355338, %v1233_v39  ;;  %v2038_v3 = vpop.f32.mrb[11].mxu0  ;;  %v1027_v39 = vld [vmem:[#allocation2 + $0x1b8] sm:$0xff] }
 0xd81   : > { %v1028_v3 = vld [vmem:[#allocation2 + $0x1c0] sm:$0xff] }
 0xd82   : > { %v1238_v40 = vsel %vm397_vm13, %v1237_v55, -inf }
 0xd83   : > { %1239 = vmax.xlane.f32.xlu1 %v1238_v40 }
 0xe10   : > { %v1240_v4 = vpop.xlane.xlu1 %1239 }
 0xe11   : > { %v1241_v41 = vsub.f32 %v1237_v55, %v1240_v4  ;;  %v2216_v55 = vpack.c.bf16 %v1027_v39, %v1026_v15  ;;  %v1030_v4 = vld [vmem:[#allocation2 + $0x1d0] sm:$0xff] }
 0xe13   : > { %v1242_v21 = vmul.f32 1.442695, %v1241_v41  ;;  %v1031_v41 = vld [vmem:[#allocation2 + $0x1d8] sm:$0xff] }
 0xe15   : > { %2341 = vpow2.f32 %v1242_v21  ;;  %v2222_v21 = vpack.c.bf16 %v1031_v41, %v1030_v4 }
 0xe1f   : > { %v2342_v5 = vpop.eup %2341 }
 0xe20   : > { %2048 = vmatmul.mubr.msk.f32.vlgmr.msra.gmra.mrb[12].mxu0 %vm397_vm13, %v2342_v5  ;;  %v1032_v5 = vld [vmem:[#allocation2 + $0x1e0] sm:$0xff] }
 0xe21   : > { %2069 = vmatprep.mubr.msk.f32.mxu0 %vm2400_vm0, %v2401_v6  ;;  %2205 = vmatpush3.bf16.msra.mxu0 %v2204_v57  ;;  %v2225_v10 = vpack.c.bf16 %v1033_v7, %v1032_v5 }
 0xe22   : > { %2206 = vmatprep.subr.bf16.mxu0 %v2399_v1 }
 0xe25   : > { %2208 = vmatpush3.bf16.msra.mxu0 %v2207_v46 }
 0xe26   : > { %2233 = vmatprep.subr.bf16.mxu0 %v2399_v1 }
 0xef3   : > { %v1313_v18 = vpop.f32.mrb[12].mxu0 }
 0xef4   : > { %1318 = vrot.lane.b32.xlu0 %v1313_v18, %s2403_s4  ;;  %v2049_v19 = vpop.f32.mrb[13].mxu0 }
 0xf66   : > { %v1319_v20 = vpop.permute.xlu0 %1318 }
 0xf67   : > { %2343 = vrcp.f32 %v1319_v20  ;;  %v1427_v20 = vrot.slane %v2643_v17, %v810_v56 }
 0xf71   : > { %v2344_v22 = vpop.eup %2343 }
 0xf72   : > { %v1322_v23 = vmul.f32 %v2344_v22, %v1313_v18  ;;  %v1037_v18 = vld [vmem:[#allocation2 + $0x208] sm:$0xff] }
 0xf73   : > { %v2231_v19 = vpack.c.bf16 %v1037_v18, %v1036_v13 }
 0xf74   : > { %2059 = vmatmul.mubr.msk.f32.vlgmr.msra.gmra.mrb[6].mxu1 %vm397_vm13, %v1322_v23 }
 0xf75   : > { %2104 = vmatprep.mubr.msk.f32.mxu1 %vm2400_vm0, %v2401_v6  ;;  %2211 = vmatpush3.bf16.msra.mxu1 %v2210_v63 }
 0xf76   : > { %2212 = vmatprep.subr.bf16.mxu1 %v2399_v1 }
 0xf79   : > { %2214 = vmatpush3.bf16.msra.mxu1 %v2213_v38 }
 0xf7a   : > { %2215 = vmatprep.subr.bf16.mxu1 %v2399_v1 }
 0xf7d   : > { %2217 = vmatpush3.bf16.msra.mxu1 %v2216_v55 }
 0xf7e   : > { %2218 = vmatprep.subr.bf16.mxu1 %v2399_v1 }
0x1047   : > { %v1396_v24 = vpop.f32.mrb[6].mxu1 }
0x1048   : > { %v1397_v25 = vadd.f32 %v1396_v24, %v1326_v34  ;;  %v2060_v26 = vpop.f32.mrb[7].mxu1 }
0x104a   : > { %v1400_v28 = vadd.f32 %v1397_v25, %v2637_v16 }
0x104c   : > { %v1401_v29 = vsel %vm397_vm13, %v1400_v28, 0.0 }
0x104d   : > { %1402 = vadd.xlane.f32.xlu0 %v1401_v29 }
0x10da   : > { %v1403_v30 = vpop.xlane.xlu0 %1402 }
0x10db   : > { %v1404_v35 = vmul.f32 0.03125, %v1403_v30 }
0x10dd   : > { %v1405_v36 = vsub.f32 %v1400_v28, %v1404_v35 }
0x10df   : > { %v1406_v42 = vmul.f32 %v1405_v36, %v1405_v36 }
0x10e1   : > { %v1407_v43 = vsel %vm397_vm13, %v1406_v42, 0.0 }
0x10e2   : > { %1408 = vadd.xlane.f32.xlu1 %v1407_v43 }
0x116f   : > { %v1409_v16 = vpop.xlane.xlu1 %1408 }
0x1170   : > { %v1410_v62 = vmul.f32 0.03125, %v1409_v16 }
0x1172   : > { %v1411_v47 = vadd.f32 1e-05, %v1410_v62 }
0x1174   : > { %2345 = vrsqrt.f32 %v1411_v47 }
0x117e   : > { %v2346_v61 = vpop.eup %2345 }
0x117f   : > { %v1413_v48 = vmul.f32 %v2346_v61, %v1405_v36 }
0x1181   : > { %v1418_v51 = vmul.f32 %v1417_v58, %v1413_v48 }
0x1183   : > { %v2704_v52 = vadd.f32 %v1422_v50, %v1418_v51 }
0x1185   : > { %2070 = vmatmul.mubr.msk.f32.vlgmr.msra.gmra.mrb[14].mxu0 %vm397_vm13, %v2704_v52 }
0x1186   : > { %2115 = vmatprep.mubr.msk.f32.mxu0 %vm2400_vm0, %v2401_v6  ;;  %v1029_v6 = vld [vmem:[#allocation2 + $0x1c8] sm:$0xff] }
0x1187   : > { %v2219_v40 = vpack.c.bf16 %v1029_v6, %v1028_v3 }
0x1189   : > { %2220 = vmatpush3.bf16.msra.mxu1 %v2219_v40 }
0x118a   : > { %2221 = vmatprep.subr.bf16.mxu1 %v2399_v1 }
0x118d   : > { %2223 = vmatpush3.bf16.msra.mxu1 %v2222_v21  ;;  %v1624_v21 = vrot.slane %v2643_v17, %v1007_v9  ;;  %v1630_v9 = vld [vmem:[#allocation2 + $0x40] sm:$0xff] }
0x118e   : > { %2224 = vmatprep.subr.bf16.mxu1 %v2399_v1  ;;  %v2237_v17 = vpack.c.bf16 %v1630_v9, %v1629_v32 }
0x1191   : > { %2226 = vmatpush3.bf16.msra.mxu1 %v2225_v10 }
0x1192   : > { %2227 = vmatprep.subr.bf16.mxu1 %v2399_v1 }
0x1195   : > { %2229 = vmatpush3.bf16.msra.mxu1 %v2228_v12 }
0x1196   : > { %2230 = vmatprep.subr.bf16.mxu1 %v2399_v1 }
0x1199   : > { %2232 = vmatpush3.bf16.msra.mxu1 %v2231_v19  ;;  %v1627_v19 = vld [vmem:[#allocation2 + $0x28] sm:$0xff] }
0x1258   : > { %v1497_v22 = vpop.f32.mrb[14].mxu0 }
0x1259   : > { %v1498_v23 = vadd.f32 %v1497_v22, %v1427_v20  ;;  %v2071_v34 = vpop.f32.mrb[15].mxu0  ;;  %v2234_v20 = vpack.c.bf16 %v1628_v8, %v1627_v19 }
0x125b   : > { %v1502_v24 = vmul.f32 0.70710677, %v1498_v23  ;;  %v1501_v48 = vmul.f32 0.5, %v1498_v23  ;;  %2235 = vmatpush3.bf16.msra.mxu0 %v2234_v20 }
0x125c   : > { %2236 = vmatprep.subr.bf16.mxu0 %v2399_v1 }
0x125d   : > { %v1505_v25 = vand.u32 2147483647, %v1502_v24  ;;  %vm1503_vm0 = vcmp.ge.f32.partialorder %v1502_v24, 0.0  ;;  %v1626_v24 = vld [vmem:[#allocation2 + $0x20] sm:$0xff] }
0x125e   : > { %v1504_v58 = vsel %vm1503_vm0, 1.0, %v2405_v27  ;;  %v1657_v1 = vrot.slane %v1626_v24, %v2591_v14 }
0x125f   : > { %v1506_v26 = vmul.f32 0.3275911, %v1505_v25  ;;  %v1519_v29 = vsub.f32 0.0, %v1505_v25  ;;  %2238 = vmatpush3.bf16.msra.mxu0 %v2237_v17 }
0x1261   : > { %v1507_v28 = vadd.f32 1.0, %v1506_v26  ;;  %v1520_v35 = vmul.f32 %v1519_v29, %v1505_v25  ;;  %v1647_v25 = vrot.slane %v1626_v24, %v2505_v33 }
0x1263   : > { %2347 = vrcp.f32 %v1507_v28  ;;  %v1521_v43 = vmul.f32 1.442695, %v1520_v35  ;;  %v1652_v28 = vrot.slane %v1626_v24, %v2581_v49 }
0x1265   : > { %2349 = vpow2.f32 %v1521_v43 }
0x126d   : > { %v2348_v30 = vpop.eup %2347 }
0x126e   : > { %v1510_v36 = vmul.f32 1.0614054, %v2348_v30 }
0x126f   : > { %v2350_v16 = vpop.eup %2349 }
0x1270   : > { %v1511_v42 = vadd.f32 -1.4531521, %v1510_v36 }
0x1272   : > { %v1512_v60 = vmul.f32 %v2348_v30, %v1511_v42 }
0x1274   : > { %v1513_v44 = vadd.f32 1.4214138, %v1512_v60 }
0x1276   : > { %v1514_v57 = vmul.f32 %v2348_v30, %v1513_v44 }
0x1278   : > { %v1515_v59 = vadd.f32 -0.28449672, %v1514_v57 }
0x127a   : > { %v1516_v56 = vmul.f32 %v2348_v30, %v1515_v59 }
0x127c   : > { %v1517_v45 = vadd.f32 0.2548296, %v1516_v56 }
0x127e   : > { %v1518_v46 = vmul.f32 %v2348_v30, %v1517_v45 }
0x1280   : > { %v1523_v62 = vmul.f32 %v2350_v16, %v1518_v46 }
0x1282   : > { %v1524_v47 = vsub.f32 1.0, %v1523_v62 }
0x1284   : > { %v1525_v61 = vmul.f32 %v1524_v47, %v1504_v58 }
0x1286   : > { %v1526_v50 = vadd.f32 1.0, %v1525_v61 }
0x1288   : > { %v1527_v51 = vmul.f32 %v1526_v50, %v1501_v48 }
0x128a   : > { %2105 = vmatmul.mubr.f32.vlgmr.msra.gmra.mrb[8].mxu1 %v1527_v51 }
0x135d   : > { %v1598_v54 = vpop.f32.mrb[8].mxu1 }
0x135e   : > { %v1599_v63 = vadd.f32 %v1598_v54, %v1531_v53  ;;  %v2106_v0 = vpop.f32.mrb[9].mxu1 }
0x1360   : > { %v1602_v2 = vadd.f32 %v1599_v63, %v2704_v52 }
0x1362   : > { %v1603_v38 = vsel %vm397_vm13, %v1602_v2, 0.0 }
0x1363   : > { %1604 = vadd.xlane.f32.xlu1 %v1603_v38 }
0x13f0   : > { %v1605_v15 = vpop.xlane.xlu1 %1604 }
0x13f1   : > { %v1606_v39 = vmul.f32 0.03125, %v1605_v15 }
0x13f3   : > { %v1607_v27 = vsub.f32 %v1602_v2, %v1606_v39 }
0x13f5   : > { %v1608_v55 = vmul.f32 %v1607_v27, %v1607_v27 }
0x13f7   : > { %v1609_v3 = vsel %vm397_vm13, %v1608_v55, 0.0 }
0x13f8   : > { %1610 = vadd.xlane.f32.xlu1 %v1609_v3 }
0x1485   : > { %v1611_v6 = vpop.xlane.xlu1 %1610 }
0x1486   : > { %v1612_v40 = vmul.f32 0.03125, %v1611_v6 }
0x1488   : > { %v1613_v4 = vadd.f32 1e-05, %v1612_v40 }
0x148a   : > { %2351 = vrsqrt.f32 %v1613_v4 }
0x1494   : > { %v2352_v41 = vpop.eup %2351 }
0x1495   : > { %v1615_v52 = vmul.f32 %v2352_v41, %v1607_v27 }
0x1497   : > { %v1620_v5 = vmul.f32 %v1619_v37, %v1615_v52 }
0x1499   : > { %v1625_v7 = vadd.f32 %v1624_v21, %v1620_v5 }
0x149b   : > { %v1631_v10 = vsel %vm397_vm13, %v1625_v7, 0.0 }
0x149c   : > { %1632 = vadd.xlane.f32.xlu0 %v1631_v10 }
0x1529   : > { %v1633_v11 = vpop.xlane.xlu0 %1632 }
0x152a   : > { %v1634_v31 = vmul.f32 0.03125, %v1633_v11 }
0x152c   : > { %v1635_v12 = vsub.f32 %v1625_v7, %v1634_v31 }
0x152e   : > { %v1636_v13 = vmul.f32 %v1635_v12, %v1635_v12 }
0x1530   : > { %v1637_v18 = vsel %vm397_vm13, %v1636_v13, 0.0 }
0x1531   : > { %1638 = vadd.xlane.f32.xlu1 %v1637_v18 }
0x15be   : > { %v1639_v22 = vpop.xlane.xlu1 %1638 }
0x15bf   : > { %v1640_v23 = vmul.f32 0.03125, %v1639_v22 }
0x15c1   : > { %v1641_v34 = vadd.f32 1e-05, %v1640_v23 }
0x15c3   : > { %2353 = vrsqrt.f32 %v1641_v34 }
0x15cd   : > { %v2354_v26 = vpop.eup %2353 }
0x15ce   : > { %v1643_v29 = vmul.f32 %v2354_v26, %v1635_v12 }
0x15d0   : > { %v1648_v30 = vmul.f32 %v1647_v25, %v1643_v29 }
0x15d2   : > { %v1653_v35 = vadd.f32 %v1652_v28, %v1648_v30 }
0x15d4   : > { %2116 = vmatmul.mubr.msk.f32.vlgmr.msra.gmra.mrb[16].mxu0 %vm397_vm13, %v1653_v35 }
0x16a7   : > { %v1727_v36 = vpop.f32.mrb[16].mxu0 }
0x16a8   : > { %v1728_v42 = vadd.f32 %v1727_v36, %v1657_v1  ;;  %v2117_v43 = vpop.f32.mrb[17].mxu0 }
0x16aa   : > { %1731 = vst [vmem:[%s153_s8] sm:$0xff] %v1728_v42 }
0x16ab PF: > { %s13_s9 = sadd.s32 1, %s2393_s9  }
0x16ac   : > { %p10_p3 = scmp.ge.s32.totalorder %s13_s9, 4  }
0x16ae   :  { %12 = sbr.rel (!%p10_p3) target bundleno = 1 (0x1), region = 63 }
0x16b5   :  { %1751 = vsyncpa [#allocation3], 1 }
0x16b6   :  { %1753 = vsyncpa [#allocation3 + $0x1], 1 }

</bundles_post_ra>
